<compile_context>
chip_gen: v7x
topology: tpu7x:2x2x1
jax: 0.10.0
libtpu: 0.0.40
codegen_flags: <defaults>
</compile_context>

<pallas_src>
import jax
import jax.numpy as jnp
from jax.experimental import pallas as pl
from jax.experimental.pallas import tpu as pltpu

D_MODEL = 32
NHEAD = 4
HEAD_DIM = D_MODEL // NHEAD
DIM_FF = 64
EPS = 1e-5  # PyTorch nn.LayerNorm default


# ----------------------------- kernel helpers --------------------------------

def _layer_norm(z, g, b):
    """LayerNorm over the last dim.  z: (S, D); g/b: (1, D)."""
    m = jnp.mean(z, axis=-1, keepdims=True)
    c = z - m
    v = jnp.mean(c * c, axis=-1, keepdims=True)
    return c * jax.lax.rsqrt(v + EPS) * g + b


def _attn_core(q, k, v, wo_t):
    """Multi-head attention core (pre-bias output projection).

    q: (Sq, D), k/v: (Skv, D), wo_t: (D, D) pre-transposed (in, out).
    Head h's context is folded straight into the output projection via the
    matching 8-row slice of wo_t and accumulated -> no lane-axis concat.
    """
    scale = 1.0 / (float(HEAD_DIM) ** 0.5)
    out = None
    for h in range(NHEAD):  # static unrolled loop over heads
        lo = h * HEAD_DIM
        hi = lo + HEAD_DIM
        qh = q[:, lo:hi]                                     # (Sq, hd)
        kh = k[:, lo:hi]                                     # (Skv, hd)
        vh = v[:, lo:hi]                                     # (Skv, hd)
        # scores: contract on the head dim of both operands (no explicit .T)
        s = jax.lax.dot_general(
            qh, kh, (((1,), (1,)), ((), ())),
            preferred_element_type=jnp.float32) * scale       # (Sq, Skv)
        s = s - jnp.max(s, axis=-1, keepdims=True)
        p = jnp.exp(s)
        p = p * pl.reciprocal(jnp.sum(p, axis=-1, keepdims=True), approx=True)
        ch = jnp.dot(p, vh, preferred_element_type=jnp.float32)          # (Sq, hd)
        oh = jnp.dot(ch, wo_t[lo:hi, :], preferred_element_type=jnp.float32)  # (Sq, D)
        out = oh if out is None else out + oh
    return out


# ----------------------------- fused kernel ----------------------------------

def _decoder_layer_kernel(
        x_ref, mem_ref,
        w_qkv_sa_ref, b_qkv_sa_ref, w_o_sa_ref, b_o_sa_ref, g1_ref, be1_ref,
        w_q_ca_ref, b_q_ca_ref, w_kv_ca_ref, b_kv_ca_ref, w_o_ca_ref, b_o_ca_ref,
        g2_ref, be2_ref,
        w1_ref, b1_ref, w2_ref, b2_ref, g3_ref, be3_ref,
        o_ref):
    """One batch element of the full decoder layer.  x_ref: (S, D), mem_ref: (Sm, D)."""
    x = x_ref[...]
    mem = mem_ref[...]

    # ---- self-attention block (dropout1 = identity) ----
    qkv = (jnp.dot(x, w_qkv_sa_ref[...], preferred_element_type=jnp.float32)
           + b_qkv_sa_ref[...])                               # (S, 3D)
    sa = _attn_core(qkv[:, :D_MODEL],
                    qkv[:, D_MODEL:2 * D_MODEL],
                    qkv[:, 2 * D_MODEL:],
                    w_o_sa_ref[...]) + b_o_sa_ref[...]
    x1 = _layer_norm(x + sa, g1_ref[...], be1_ref[...])

    # ---- cross-attention block (dropout2 = identity) ----
    q = (jnp.dot(x1, w_q_ca_ref[...], preferred_element_type=jnp.float32)
         + b_q_ca_ref[...])                                   # (S, D)
    kv = (jnp.dot(mem, w_kv_ca_ref[...], preferred_element_type=jnp.float32)
          + b_kv_ca_ref[...])                                 # (Sm, 2D)
    ca = _attn_core(q, kv[:, :D_MODEL], kv[:, D_MODEL:],
                    w_o_ca_ref[...]) + b_o_ca_ref[...]
    x2 = _layer_norm(x1 + ca, g2_ref[...], be2_ref[...])

    # ---- feed-forward block (dropout / dropout3 = identity) ----
    h = jnp.maximum(
        jnp.dot(x2, w1_ref[...], preferred_element_type=jnp.float32) + b1_ref[...],
        0.0)
    ff = jnp.dot(h, w2_ref[...], preferred_element_type=jnp.float32) + b2_ref[...]
    o_ref[...] = _layer_norm(x2 + ff, g3_ref[...], be3_ref[...])


# ----------------------------- wrapper ----------------------------------------

def simple_decoder_layer(x_sbd, mem_sbd, flat_params):
    """x: (S, B, D), memory: (Sm, B, D) -> (S, B, D).  Inference semantics."""
    S, B, D = x_sbd.shape
    Sm = mem_sbd.shape[0]
    # (S,B,D) -> (B,S,D): tiny XLA transposes; per-batch blocks then load cleanly.
    x_bsd = jnp.transpose(x_sbd, (1, 0, 2))
    mem_bsd = jnp.transpose(mem_sbd, (1, 0, 2))

    data_specs = [
        pl.BlockSpec((None, S, D), lambda b: (b, 0, 0)),
        pl.BlockSpec((None, Sm, D), lambda b: (b, 0, 0)),
    ]
    # Weights/biases: full-array blocks, same block index for every grid step
    # -> DMA'd once, resident in VMEM for the whole grid.
    param_specs = [
        pl.BlockSpec(p.shape, lambda b, _nd=p.ndim: (0,) * _nd) for p in flat_params
    ]

    out = pl.pallas_call(
        _decoder_layer_kernel,
        grid=(B,),
        in_specs=data_specs + param_specs,
        out_specs=pl.BlockSpec((None, S, D), lambda b: (b, 0, 0)),
        out_shape=jax.ShapeDtypeStruct((B, S, D), jnp.float32),
        compiler_params=pltpu.CompilerParams(
            dimension_semantics=("parallel",)),   # both TCs on v7x
    )(x_bsd, mem_bsd, *flat_params)
    return jnp.transpose(out, (1, 0, 2))


# ----------------------------- parameter packing -------------------------------

def pack_params(tp):
    """PyTorch-layout params -> fused/pre-transposed flat list (kernel arg order)."""
    wq, wk, wv, bq, bk, bv, wo, bo = tp["self_attn"]
    self_attn = [
        jnp.concatenate([wq.T, wk.T, wv.T], axis=1),   # (D, 3D)
        jnp.concatenate([bq, bk, bv], axis=1),         # (1, 3D)
        wo.T,                                          # (D, D)
        bo,                                            # (1, D)
    ]
    wq, wk, wv, bq, bk, bv, wo, bo = tp["cross_attn"]
    cross_attn = [
        wq.T, bq,                                      # (D, D), (1, D)
        jnp.concatenate([wk.T, wv.T], axis=1),         # (D, 2D)
        jnp.concatenate([bk, bv], axis=1),             # (1, 2D)
        wo.T, bo,                                      # (D, D), (1, D)
    ]
    w1, b1, w2, b2 = tp["ffn"]
    ffn = [w1.T, b1, w2.T, b2]                         # (D, F), (1, F), (F, D), (1, D)

    return (self_attn + list(tp["norm1"])
            + cross_attn + list(tp["norm2"])
            + ffn + list(tp["norm3"]))


def init_torch_params(key):
    """Parameters in PyTorch layout (out_features, in_features) for the reference."""
    ks = jax.random.split(key, 20)

    def w(k, shape):
        return jax.random.normal(k, shape, jnp.float32) * 0.02

    def attn(kk):
        return (
            w(kk[0], (D_MODEL, D_MODEL)),   # Wq
            w(kk[1], (D_MODEL, D_MODEL)),   # Wk
            w(kk[2], (D_MODEL, D_MODEL)),   # Wv
            w(kk[3], (1, D_MODEL)),         # bq
            w(kk[4], (1, D_MODEL)),         # bk
            w(kk[5], (1, D_MODEL)),         # bv
            w(kk[6], (D_MODEL, D_MODEL)),   # Wo
            w(kk[7], (1, D_MODEL)),         # bo
        )

    ones = jnp.ones((1, D_MODEL), jnp.float32)
    zeros = jnp.zeros((1, D_MODEL), jnp.float32)
    return {
        "self_attn": attn(ks[0:8]),
        "cross_attn": attn(ks[8:16]),
        "norm1": (ones, zeros),
        "norm2": (ones, zeros),
        "norm3": (ones, zeros),
        "ffn": (
            w(ks[16], (DIM_FF, D_MODEL)),   # linear1.weight
            w(ks[17], (1, DIM_FF)),         # linear1.bias
            w(ks[18], (D_MODEL, DIM_FF)),   # linear2.weight
            w(ks[19], (1, D_MODEL)),        # linear2.bias
        ),
    }


# ----------------------------- reference (plain JAX) ---------------------------

def _mha_ref(q, kv, p):
    wq, wk, wv, bq, bk, bv, wo, bo = p
    Q = q @ wq.T + bq
    K = kv @ wk.T + bk
    V = kv @ wv.T + bv
    B, Sq, _ = Q.shape
    Skv = K.shape[1]
    Qh = Q.reshape(B, Sq, NHEAD, HEAD_DIM)
    Kh = K.reshape(B, Skv, NHEAD, HEAD_DIM)
    Vh = V.reshape(B, Skv, NHEAD, HEAD_DIM)
    s = jnp.einsum("bqhd,bkhd->bhqk", Qh, Kh) / jnp.sqrt(jnp.float32(HEAD_DIM))
    a = jax.nn.softmax(s, axis=-1)
    ctx = jnp.einsum("bhqk,bkhd->bqhd", a, Vh).reshape(B, Sq, D_MODEL)
    return ctx @ wo.T + bo


def _ln_ref(z, gamma, beta):
    m = z.mean(-1, keepdims=True)
    v = ((z - m) ** 2).mean(-1, keepdims=True)
    return (z - m) / jnp.sqrt(v + EPS) * gamma + beta


def ref_forward(x_sbd, mem_sbd, tp):
    x = jnp.transpose(x_sbd, (1, 0, 2))
    mem = jnp.transpose(mem_sbd, (1, 0, 2))
    x = _ln_ref(x + _mha_ref(x, x, tp["self_attn"]), *tp["norm1"])
    x = _ln_ref(x + _mha_ref(x, mem, tp["cross_attn"]), *tp["norm2"])
    w1, b1, w2, b2 = tp["ffn"]
    h = jnp.maximum(x @ w1.T + b1, 0.0)
    x = _ln_ref(x + (h @ w2.T + b2), *tp["norm3"])
    return jnp.transpose(x, (1, 0, 2))


# ----------------------------- setup & run -------------------------------------

if __name__ == "__main__":
    key = jax.random.PRNGKey(0)
    kp, kx, km = jax.random.split(key, 3)

    S, S_MEM, B = 8, 12, 2
    x = jax.random.normal(kx, (S, B, D_MODEL), jnp.float32)       # target (seq-first)
    memory = jax.random.normal(km, (S_MEM, B, D_MODEL), jnp.float32)

    torch_params = init_torch_params(kp)
    kernel_params = pack_params(torch_params)

    out = jax.jit(simple_decoder_layer)(x, memory, kernel_params)
    out = jax.block_until_ready(out)

    ref = ref_forward(x, memory, torch_params)
    assert out.shape == (S, B, D_MODEL)
    # tolerance covers the EUP approximate-reciprocal in the softmax denominator
    assert bool(jnp.allclose(out, ref, atol=1e-3, rtol=1e-3)), "mismatch vs reference"

    print("KERNEL_OK")
</pallas_src>

<mosaic_0001>
module attributes {stable_mosaic.version = 11 : i64} {
  func.func @_decoder_layer_kernel(%arg0: i32, %arg1: memref<1x8x32xf32, #tpu.memory_space<vmem>>, %arg2: memref<1x12x32xf32, #tpu.memory_space<vmem>>, %arg3: memref<32x96xf32, #tpu.memory_space<vmem>>, %arg4: memref<1x96xf32, #tpu.memory_space<vmem>>, %arg5: memref<32x32xf32, #tpu.memory_space<vmem>>, %arg6: memref<1x32xf32, #tpu.memory_space<vmem>>, %arg7: memref<1x32xf32, #tpu.memory_space<vmem>>, %arg8: memref<1x32xf32, #tpu.memory_space<vmem>>, %arg9: memref<32x32xf32, #tpu.memory_space<vmem>>, %arg10: memref<1x32xf32, #tpu.memory_space<vmem>>, %arg11: memref<32x64xf32, #tpu.memory_space<vmem>>, %arg12: memref<1x64xf32, #tpu.memory_space<vmem>>, %arg13: memref<32x32xf32, #tpu.memory_space<vmem>>, %arg14: memref<1x32xf32, #tpu.memory_space<vmem>>, %arg15: memref<1x32xf32, #tpu.memory_space<vmem>>, %arg16: memref<1x32xf32, #tpu.memory_space<vmem>>, %arg17: memref<32x64xf32, #tpu.memory_space<vmem>>, %arg18: memref<1x64xf32, #tpu.memory_space<vmem>>, %arg19: memref<64x32xf32, #tpu.memory_space<vmem>>, %arg20: memref<1x32xf32, #tpu.memory_space<vmem>>, %arg21: memref<1x32xf32, #tpu.memory_space<vmem>>, %arg22: memref<1x32xf32, #tpu.memory_space<vmem>>, %arg23: memref<1x8x32xf32, #tpu.memory_space<vmem>>) attributes {dimension_semantics = [#tpu.dimension_semantics<parallel>], iteration_bounds = array<i64: 2>, scalar_prefetch = 0 : i64, scratch_operands = 0 : i64, tpu.core_type = #tpu.core_type<tc>, window_params = [{transform_indices = @transform_0, window_bounds = array<i64: 1, 8, 32>}, {transform_indices = @transform_1, window_bounds = array<i64: 1, 12, 32>}, {pipeline_mode = #tpu.pipeline_mode<synchronous>, transform_indices = @transform_2, window_bounds = array<i64: 32, 96>}, {pipeline_mode = #tpu.pipeline_mode<synchronous>, transform_indices = @transform_3, window_bounds = array<i64: 1, 96>}, {pipeline_mode = #tpu.pipeline_mode<synchronous>, transform_indices = @transform_4, window_bounds = array<i64: 32, 32>}, {pipeline_mode = #tpu.pipeline_mode<synchronous>, transform_indices = @transform_5, window_bounds = array<i64: 1, 32>}, {pipeline_mode = #tpu.pipeline_mode<synchronous>, transform_indices = @transform_6, window_bounds = array<i64: 1, 32>}, {pipeline_mode = #tpu.pipeline_mode<synchronous>, transform_indices = @transform_7, window_bounds = array<i64: 1, 32>}, {pipeline_mode = #tpu.pipeline_mode<synchronous>, transform_indices = @transform_8, window_bounds = array<i64: 32, 32>}, {pipeline_mode = #tpu.pipeline_mode<synchronous>, transform_indices = @transform_9, window_bounds = array<i64: 1, 32>}, {pipeline_mode = #tpu.pipeline_mode<synchronous>, transform_indices = @transform_10, window_bounds = array<i64: 32, 64>}, {pipeline_mode = #tpu.pipeline_mode<synchronous>, transform_indices = @transform_11, window_bounds = array<i64: 1, 64>}, {pipeline_mode = #tpu.pipeline_mode<synchronous>, transform_indices = @transform_12, window_bounds = array<i64: 32, 32>}, {pipeline_mode = #tpu.pipeline_mode<synchronous>, transform_indices = @transform_13, window_bounds = array<i64: 1, 32>}, {pipeline_mode = #tpu.pipeline_mode<synchronous>, transform_indices = @transform_14, window_bounds = array<i64: 1, 32>}, {pipeline_mode = #tpu.pipeline_mode<synchronous>, transform_indices = @transform_15, window_bounds = array<i64: 1, 32>}, {pipeline_mode = #tpu.pipeline_mode<synchronous>, transform_indices = @transform_16, window_bounds = array<i64: 32, 64>}, {pipeline_mode = #tpu.pipeline_mode<synchronous>, transform_indices = @transform_17, window_bounds = array<i64: 1, 64>}, {pipeline_mode = #tpu.pipeline_mode<synchronous>, transform_indices = @transform_18, window_bounds = array<i64: 64, 32>}, {pipeline_mode = #tpu.pipeline_mode<synchronous>, transform_indices = @transform_19, window_bounds = array<i64: 1, 32>}, {pipeline_mode = #tpu.pipeline_mode<synchronous>, transform_indices = @transform_20, window_bounds = array<i64: 1, 32>}, {pipeline_mode = #tpu.pipeline_mode<synchronous>, transform_indices = @transform_21, window_bounds = array<i64: 1, 32>}, {transform_indices = @transform_22, window_bounds = array<i64: 1, 8, 32>}]} {
    %c0 = arith.constant 0 : index
    %c0_0 = arith.constant 0 : index
    %c0_1 = arith.constant 0 : index
    %0 = vector.load %arg1[%c0, %c0_0, %c0_1] : memref<1x8x32xf32, #tpu.memory_space<vmem>>, vector<1x8x32xf32>
    %1 = vector.shape_cast %0 : vector<1x8x32xf32> to vector<8x32xf32>
    %c0_2 = arith.constant 0 : index
    %c0_3 = arith.constant 0 : index
    %c0_4 = arith.constant 0 : index
    %2 = vector.load %arg2[%c0_2, %c0_3, %c0_4] : memref<1x12x32xf32, #tpu.memory_space<vmem>>, vector<1x12x32xf32>
    %3 = vector.shape_cast %2 : vector<1x12x32xf32> to vector<12x32xf32>
    %c0_5 = arith.constant 0 : index
    %c0_6 = arith.constant 0 : index
    %4 = vector.load %arg3[%c0_5, %c0_6] : memref<32x96xf32, #tpu.memory_space<vmem>>, vector<32x96xf32>
    %cst = arith.constant dense<0.000000e+00> : vector<8x96xf32>
    %5 = tpu.matmul %1, %4, %cst {dimension_numbers = #tpu.dot_dimension_numbers<[1], [0], [0], [1], [0, 0, 1, 1], [], []>} : vector<8x32xf32>, vector<32x96xf32>, vector<8x96xf32> -> vector<8x96xf32>
    %c0_7 = arith.constant 0 : index
    %c0_8 = arith.constant 0 : index
    %6 = vector.load %arg4[%c0_7, %c0_8] : memref<1x96xf32, #tpu.memory_space<vmem>>, vector<1x96xf32>
    %7 = vector.broadcast %6 : vector<1x96xf32> to vector<8x96xf32>
    %8 = arith.addf %5, %7 : vector<8x96xf32>
    %9 = vector.extract_strided_slice %8 {offsets = [0, 0], sizes = [8, 32], strides = [1, 1]} : vector<8x96xf32> to vector<8x32xf32>
    %10 = vector.extract_strided_slice %8 {offsets = [0, 32], sizes = [8, 32], strides = [1, 1]} : vector<8x96xf32> to vector<8x32xf32>
    %11 = vector.extract_strided_slice %8 {offsets = [0, 64], sizes = [8, 32], strides = [1, 1]} : vector<8x96xf32> to vector<8x32xf32>
    %c0_9 = arith.constant 0 : index
    %c0_10 = arith.constant 0 : index
    %12 = vector.load %arg5[%c0_9, %c0_10] : memref<32x32xf32, #tpu.memory_space<vmem>>, vector<32x32xf32>
    %13 = vector.extract_strided_slice %9 {offsets = [0, 0], sizes = [8, 8], strides = [1, 1]} : vector<8x32xf32> to vector<8x8xf32>
    %14 = vector.extract_strided_slice %10 {offsets = [0, 0], sizes = [8, 8], strides = [1, 1]} : vector<8x32xf32> to vector<8x8xf32>
    %15 = vector.extract_strided_slice %11 {offsets = [0, 0], sizes = [8, 8], strides = [1, 1]} : vector<8x32xf32> to vector<8x8xf32>
    %cst_11 = arith.constant dense<0.000000e+00> : vector<8x8xf32>
    %16 = tpu.matmul %13, %14, %cst_11 {dimension_numbers = #tpu.dot_dimension_numbers<[1], [1], [0], [0], [0, 0, 1, 0], [], []>} : vector<8x8xf32>, vector<8x8xf32>, vector<8x8xf32> -> vector<8x8xf32>
    %cst_12 = arith.constant 0.353553385 : f32
    %17 = vector.broadcast %cst_12 : f32 to vector<8x8xf32>
    %18 = arith.mulf %16, %17 : vector<8x8xf32>
    %cst_13 = arith.constant dense<0xFF800000> : vector<8xf32>
    %19 = vector.multi_reduction <maximumf>, %18, %cst_13 [1] : vector<8x8xf32> to vector<8xf32>
    %20 = vector.shape_cast %19 : vector<8xf32> to vector<8x1xf32>
    %21 = vector.broadcast %20 : vector<8x1xf32> to vector<8x8xf32>
    %22 = arith.subf %18, %21 : vector<8x8xf32>
    %23 = math.exp %22 : vector<8x8xf32>
    %cst_14 = arith.constant dense<0.000000e+00> : vector<8xf32>
    %24 = vector.multi_reduction <add>, %23, %cst_14 [1] : vector<8x8xf32> to vector<8xf32>
    %25 = vector.shape_cast %24 : vector<8xf32> to vector<8x1xf32>
    %26 = tpu.reciprocal %25 {approx = true} : vector<8x1xf32> -> vector<8x1xf32>
    %27 = vector.broadcast %26 : vector<8x1xf32> to vector<8x8xf32>
    %28 = arith.mulf %23, %27 : vector<8x8xf32>
    %cst_15 = arith.constant dense<0.000000e+00> : vector<8x8xf32>
    %29 = tpu.matmul %28, %15, %cst_15 {dimension_numbers = #tpu.dot_dimension_numbers<[1], [0], [0], [1], [0, 0, 1, 1], [], []>} : vector<8x8xf32>, vector<8x8xf32>, vector<8x8xf32> -> vector<8x8xf32>
    %30 = vector.extract_strided_slice %12 {offsets = [0, 0], sizes = [8, 32], strides = [1, 1]} : vector<32x32xf32> to vector<8x32xf32>
    %cst_16 = arith.constant dense<0.000000e+00> : vector<8x32xf32>
    %31 = tpu.matmul %29, %30, %cst_16 {dimension_numbers = #tpu.dot_dimension_numbers<[1], [0], [0], [1], [0, 0, 1, 1], [], []>} : vector<8x8xf32>, vector<8x32xf32>, vector<8x32xf32> -> vector<8x32xf32>
    %32 = vector.extract_strided_slice %9 {offsets = [0, 8], sizes = [8, 8], strides = [1, 1]} : vector<8x32xf32> to vector<8x8xf32>
    %33 = vector.extract_strided_slice %10 {offsets = [0, 8], sizes = [8, 8], strides = [1, 1]} : vector<8x32xf32> to vector<8x8xf32>
    %34 = vector.extract_strided_slice %11 {offsets = [0, 8], sizes = [8, 8], strides = [1, 1]} : vector<8x32xf32> to vector<8x8xf32>
    %cst_17 = arith.constant dense<0.000000e+00> : vector<8x8xf32>
    %35 = tpu.matmul %32, %33, %cst_17 {dimension_numbers = #tpu.dot_dimension_numbers<[1], [1], [0], [0], [0, 0, 1, 0], [], []>} : vector<8x8xf32>, vector<8x8xf32>, vector<8x8xf32> -> vector<8x8xf32>
    %cst_18 = arith.constant 0.353553385 : f32
    %36 = vector.broadcast %cst_18 : f32 to vector<8x8xf32>
    %37 = arith.mulf %35, %36 : vector<8x8xf32>
    %cst_19 = arith.constant dense<0xFF800000> : vector<8xf32>
    %38 = vector.multi_reduction <maximumf>, %37, %cst_19 [1] : vector<8x8xf32> to vector<8xf32>
    %39 = vector.shape_cast %38 : vector<8xf32> to vector<8x1xf32>
    %40 = vector.broadcast %39 : vector<8x1xf32> to vector<8x8xf32>
    %41 = arith.subf %37, %40 : vector<8x8xf32>
    %42 = math.exp %41 : vector<8x8xf32>
    %cst_20 = arith.constant dense<0.000000e+00> : vector<8xf32>
    %43 = vector.multi_reduction <add>, %42, %cst_20 [1] : vector<8x8xf32> to vector<8xf32>
    %44 = vector.shape_cast %43 : vector<8xf32> to vector<8x1xf32>
    %45 = tpu.reciprocal %44 {approx = true} : vector<8x1xf32> -> vector<8x1xf32>
    %46 = vector.broadcast %45 : vector<8x1xf32> to vector<8x8xf32>
    %47 = arith.mulf %42, %46 : vector<8x8xf32>
    %cst_21 = arith.constant dense<0.000000e+00> : vector<8x8xf32>
    %48 = tpu.matmul %47, %34, %cst_21 {dimension_numbers = #tpu.dot_dimension_numbers<[1], [0], [0], [1], [0, 0, 1, 1], [], []>} : vector<8x8xf32>, vector<8x8xf32>, vector<8x8xf32> -> vector<8x8xf32>
    %49 = vector.extract_strided_slice %12 {offsets = [8, 0], sizes = [8, 32], strides = [1, 1]} : vector<32x32xf32> to vector<8x32xf32>
    %cst_22 = arith.constant dense<0.000000e+00> : vector<8x32xf32>
    %50 = tpu.matmul %48, %49, %cst_22 {dimension_numbers = #tpu.dot_dimension_numbers<[1], [0], [0], [1], [0, 0, 1, 1], [], []>} : vector<8x8xf32>, vector<8x32xf32>, vector<8x32xf32> -> vector<8x32xf32>
    %51 = arith.addf %31, %50 : vector<8x32xf32>
    %52 = vector.extract_strided_slice %9 {offsets = [0, 16], sizes = [8, 8], strides = [1, 1]} : vector<8x32xf32> to vector<8x8xf32>
    %53 = vector.extract_strided_slice %10 {offsets = [0, 16], sizes = [8, 8], strides = [1, 1]} : vector<8x32xf32> to vector<8x8xf32>
    %54 = vector.extract_strided_slice %11 {offsets = [0, 16], sizes = [8, 8], strides = [1, 1]} : vector<8x32xf32> to vector<8x8xf32>
    %cst_23 = arith.constant dense<0.000000e+00> : vector<8x8xf32>
    %55 = tpu.matmul %52, %53, %cst_23 {dimension_numbers = #tpu.dot_dimension_numbers<[1], [1], [0], [0], [0, 0, 1, 0], [], []>} : vector<8x8xf32>, vector<8x8xf32>, vector<8x8xf32> -> vector<8x8xf32>
    %cst_24 = arith.constant 0.353553385 : f32
    %56 = vector.broadcast %cst_24 : f32 to vector<8x8xf32>
    %57 = arith.mulf %55, %56 : vector<8x8xf32>
    %cst_25 = arith.constant dense<0xFF800000> : vector<8xf32>
    %58 = vector.multi_reduction <maximumf>, %57, %cst_25 [1] : vector<8x8xf32> to vector<8xf32>
    %59 = vector.shape_cast %58 : vector<8xf32> to vector<8x1xf32>
    %60 = vector.broadcast %59 : vector<8x1xf32> to vector<8x8xf32>
    %61 = arith.subf %57, %60 : vector<8x8xf32>
    %62 = math.exp %61 : vector<8x8xf32>
    %cst_26 = arith.constant dense<0.000000e+00> : vector<8xf32>
    %63 = vector.multi_reduction <add>, %62, %cst_26 [1] : vector<8x8xf32> to vector<8xf32>
    %64 = vector.shape_cast %63 : vector<8xf32> to vector<8x1xf32>
    %65 = tpu.reciprocal %64 {approx = true} : vector<8x1xf32> -> vector<8x1xf32>
    %66 = vector.broadcast %65 : vector<8x1xf32> to vector<8x8xf32>
    %67 = arith.mulf %62, %66 : vector<8x8xf32>
    %cst_27 = arith.constant dense<0.000000e+00> : vector<8x8xf32>
    %68 = tpu.matmul %67, %54, %cst_27 {dimension_numbers = #tpu.dot_dimension_numbers<[1], [0], [0], [1], [0, 0, 1, 1], [], []>} : vector<8x8xf32>, vector<8x8xf32>, vector<8x8xf32> -> vector<8x8xf32>
    %69 = vector.extract_strided_slice %12 {offsets = [16, 0], sizes = [8, 32], strides = [1, 1]} : vector<32x32xf32> to vector<8x32xf32>
    %cst_28 = arith.constant dense<0.000000e+00> : vector<8x32xf32>
    %70 = tpu.matmul %68, %69, %cst_28 {dimension_numbers = #tpu.dot_dimension_numbers<[1], [0], [0], [1], [0, 0, 1, 1], [], []>} : vector<8x8xf32>, vector<8x32xf32>, vector<8x32xf32> -> vector<8x32xf32>
    %71 = arith.addf %51, %70 : vector<8x32xf32>
    %72 = vector.extract_strided_slice %9 {offsets = [0, 24], sizes = [8, 8], strides = [1, 1]} : vector<8x32xf32> to vector<8x8xf32>
    %73 = vector.extract_strided_slice %10 {offsets = [0, 24], sizes = [8, 8], strides = [1, 1]} : vector<8x32xf32> to vector<8x8xf32>
    %74 = vector.extract_strided_slice %11 {offsets = [0, 24], sizes = [8, 8], strides = [1, 1]} : vector<8x32xf32> to vector<8x8xf32>
    %cst_29 = arith.constant dense<0.000000e+00> : vector<8x8xf32>
    %75 = tpu.matmul %72, %73, %cst_29 {dimension_numbers = #tpu.dot_dimension_numbers<[1], [1], [0], [0], [0, 0, 1, 0], [], []>} : vector<8x8xf32>, vector<8x8xf32>, vector<8x8xf32> -> vector<8x8xf32>
    %cst_30 = arith.constant 0.353553385 : f32
    %76 = vector.broadcast %cst_30 : f32 to vector<8x8xf32>
    %77 = arith.mulf %75, %76 : vector<8x8xf32>
    %cst_31 = arith.constant dense<0xFF800000> : vector<8xf32>
    %78 = vector.multi_reduction <maximumf>, %77, %cst_31 [1] : vector<8x8xf32> to vector<8xf32>
    %79 = vector.shape_cast %78 : vector<8xf32> to vector<8x1xf32>
    %80 = vector.broadcast %79 : vector<8x1xf32> to vector<8x8xf32>
    %81 = arith.subf %77, %80 : vector<8x8xf32>
    %82 = math.exp %81 : vector<8x8xf32>
    %cst_32 = arith.constant dense<0.000000e+00> : vector<8xf32>
    %83 = vector.multi_reduction <add>, %82, %cst_32 [1] : vector<8x8xf32> to vector<8xf32>
    %84 = vector.shape_cast %83 : vector<8xf32> to vector<8x1xf32>
    %85 = tpu.reciprocal %84 {approx = true} : vector<8x1xf32> -> vector<8x1xf32>
    %86 = vector.broadcast %85 : vector<8x1xf32> to vector<8x8xf32>
    %87 = arith.mulf %82, %86 : vector<8x8xf32>
    %cst_33 = arith.constant dense<0.000000e+00> : vector<8x8xf32>
    %88 = tpu.matmul %87, %74, %cst_33 {dimension_numbers = #tpu.dot_dimension_numbers<[1], [0], [0], [1], [0, 0, 1, 1], [], []>} : vector<8x8xf32>, vector<8x8xf32>, vector<8x8xf32> -> vector<8x8xf32>
    %89 = vector.extract_strided_slice %12 {offsets = [24, 0], sizes = [8, 32], strides = [1, 1]} : vector<32x32xf32> to vector<8x32xf32>
    %cst_34 = arith.constant dense<0.000000e+00> : vector<8x32xf32>
    %90 = tpu.matmul %88, %89, %cst_34 {dimension_numbers = #tpu.dot_dimension_numbers<[1], [0], [0], [1], [0, 0, 1, 1], [], []>} : vector<8x8xf32>, vector<8x32xf32>, vector<8x32xf32> -> vector<8x32xf32>
    %91 = arith.addf %71, %90 : vector<8x32xf32>
    %c0_35 = arith.constant 0 : index
    %c0_36 = arith.constant 0 : index
    %92 = vector.load %arg6[%c0_35, %c0_36] : memref<1x32xf32, #tpu.memory_space<vmem>>, vector<1x32xf32>
    %93 = vector.broadcast %92 : vector<1x32xf32> to vector<8x32xf32>
    %94 = arith.addf %91, %93 : vector<8x32xf32>
    %95 = arith.addf %1, %94 : vector<8x32xf32>
    %c0_37 = arith.constant 0 : index
    %c0_38 = arith.constant 0 : index
    %96 = vector.load %arg7[%c0_37, %c0_38] : memref<1x32xf32, #tpu.memory_space<vmem>>, vector<1x32xf32>
    %c0_39 = arith.constant 0 : index
    %c0_40 = arith.constant 0 : index
    %97 = vector.load %arg8[%c0_39, %c0_40] : memref<1x32xf32, #tpu.memory_space<vmem>>, vector<1x32xf32>
    %cst_41 = arith.constant dense<0.000000e+00> : vector<8xf32>
    %98 = vector.multi_reduction <add>, %95, %cst_41 [1] : vector<8x32xf32> to vector<8xf32>
    %99 = vector.shape_cast %98 : vector<8xf32> to vector<8x1xf32>
    %cst_42 = arith.constant 3.200000e+01 : f32
    %100 = vector.broadcast %cst_42 : f32 to vector<8x1xf32>
    %101 = arith.divf %99, %100 : vector<8x1xf32>
    %102 = vector.broadcast %101 : vector<8x1xf32> to vector<8x32xf32>
    %103 = arith.subf %95, %102 : vector<8x32xf32>
    %104 = arith.mulf %103, %103 : vector<8x32xf32>
    %cst_43 = arith.constant dense<0.000000e+00> : vector<8xf32>
    %105 = vector.multi_reduction <add>, %104, %cst_43 [1] : vector<8x32xf32> to vector<8xf32>
    %106 = vector.shape_cast %105 : vector<8xf32> to vector<8x1xf32>
    %cst_44 = arith.constant 3.200000e+01 : f32
    %107 = vector.broadcast %cst_44 : f32 to vector<8x1xf32>
    %108 = arith.divf %106, %107 : vector<8x1xf32>
    %cst_45 = arith.constant 9.99999974E-6 : f32
    %109 = vector.broadcast %cst_45 : f32 to vector<8x1xf32>
    %110 = arith.addf %108, %109 : vector<8x1xf32>
    %111 = math.rsqrt %110 : vector<8x1xf32>
    %112 = vector.broadcast %111 : vector<8x1xf32> to vector<8x32xf32>
    %113 = arith.mulf %103, %112 : vector<8x32xf32>
    %114 = vector.broadcast %96 : vector<1x32xf32> to vector<8x32xf32>
    %115 = arith.mulf %113, %114 : vector<8x32xf32>
    %116 = vector.broadcast %97 : vector<1x32xf32> to vector<8x32xf32>
    %117 = arith.addf %115, %116 : vector<8x32xf32>
    %c0_46 = arith.constant 0 : index
    %c0_47 = arith.constant 0 : index
    %118 = vector.load %arg9[%c0_46, %c0_47] : memref<32x32xf32, #tpu.memory_space<vmem>>, vector<32x32xf32>
    %cst_48 = arith.constant dense<0.000000e+00> : vector<8x32xf32>
    %119 = tpu.matmul %117, %118, %cst_48 {dimension_numbers = #tpu.dot_dimension_numbers<[1], [0], [0], [1], [0, 0, 1, 1], [], []>} : vector<8x32xf32>, vector<32x32xf32>, vector<8x32xf32> -> vector<8x32xf32>
    %c0_49 = arith.constant 0 : index
    %c0_50 = arith.constant 0 : index
    %120 = vector.load %arg10[%c0_49, %c0_50] : memref<1x32xf32, #tpu.memory_space<vmem>>, vector<1x32xf32>
    %121 = vector.broadcast %120 : vector<1x32xf32> to vector<8x32xf32>
    %122 = arith.addf %119, %121 : vector<8x32xf32>
    %c0_51 = arith.constant 0 : index
    %c0_52 = arith.constant 0 : index
    %123 = vector.load %arg11[%c0_51, %c0_52] : memref<32x64xf32, #tpu.memory_space<vmem>>, vector<32x64xf32>
    %cst_53 = arith.constant dense<0.000000e+00> : vector<12x64xf32>
    %124 = tpu.matmul %3, %123, %cst_53 {dimension_numbers = #tpu.dot_dimension_numbers<[1], [0], [0], [1], [0, 0, 1, 1], [], []>} : vector<12x32xf32>, vector<32x64xf32>, vector<12x64xf32> -> vector<12x64xf32>
    %c0_54 = arith.constant 0 : index
    %c0_55 = arith.constant 0 : index
    %125 = vector.load %arg12[%c0_54, %c0_55] : memref<1x64xf32, #tpu.memory_space<vmem>>, vector<1x64xf32>
    %126 = vector.broadcast %125 : vector<1x64xf32> to vector<12x64xf32>
    %127 = arith.addf %124, %126 : vector<12x64xf32>
    %128 = vector.extract_strided_slice %127 {offsets = [0, 0], sizes = [12, 32], strides = [1, 1]} : vector<12x64xf32> to vector<12x32xf32>
    %129 = vector.extract_strided_slice %127 {offsets = [0, 32], sizes = [12, 32], strides = [1, 1]} : vector<12x64xf32> to vector<12x32xf32>
    %c0_56 = arith.constant 0 : index
    %c0_57 = arith.constant 0 : index
    %130 = vector.load %arg13[%c0_56, %c0_57] : memref<32x32xf32, #tpu.memory_space<vmem>>, vector<32x32xf32>
    %131 = vector.extract_strided_slice %122 {offsets = [0, 0], sizes = [8, 8], strides = [1, 1]} : vector<8x32xf32> to vector<8x8xf32>
    %132 = vector.extract_strided_slice %128 {offsets = [0, 0], sizes = [12, 8], strides = [1, 1]} : vector<12x32xf32> to vector<12x8xf32>
    %133 = vector.extract_strided_slice %129 {offsets = [0, 0], sizes = [12, 8], strides = [1, 1]} : vector<12x32xf32> to vector<12x8xf32>
    %cst_58 = arith.constant dense<0.000000e+00> : vector<8x12xf32>
    %134 = tpu.matmul %131, %132, %cst_58 {dimension_numbers = #tpu.dot_dimension_numbers<[1], [1], [0], [0], [0, 0, 1, 0], [], []>} : vector<8x8xf32>, vector<12x8xf32>, vector<8x12xf32> -> vector<8x12xf32>
    %cst_59 = arith.constant 0.353553385 : f32
    %135 = vector.broadcast %cst_59 : f32 to vector<8x12xf32>
    %136 = arith.mulf %134, %135 : vector<8x12xf32>
    %cst_60 = arith.constant dense<0xFF800000> : vector<8xf32>
    %137 = vector.multi_reduction <maximumf>, %136, %cst_60 [1] : vector<8x12xf32> to vector<8xf32>
    %138 = vector.shape_cast %137 : vector<8xf32> to vector<8x1xf32>
    %139 = vector.broadcast %138 : vector<8x1xf32> to vector<8x12xf32>
    %140 = arith.subf %136, %139 : vector<8x12xf32>
    %141 = math.exp %140 : vector<8x12xf32>
    %cst_61 = arith.constant dense<0.000000e+00> : vector<8xf32>
    %142 = vector.multi_reduction <add>, %141, %cst_61 [1] : vector<8x12xf32> to vector<8xf32>
    %143 = vector.shape_cast %142 : vector<8xf32> to vector<8x1xf32>
    %144 = tpu.reciprocal %143 {approx = true} : vector<8x1xf32> -> vector<8x1xf32>
    %145 = vector.broadcast %144 : vector<8x1xf32> to vector<8x12xf32>
    %146 = arith.mulf %141, %145 : vector<8x12xf32>
    %cst_62 = arith.constant dense<0.000000e+00> : vector<8x8xf32>
    %147 = tpu.matmul %146, %133, %cst_62 {dimension_numbers = #tpu.dot_dimension_numbers<[1], [0], [0], [1], [0, 0, 1, 1], [], []>} : vector<8x12xf32>, vector<12x8xf32>, vector<8x8xf32> -> vector<8x8xf32>
    %148 = vector.extract_strided_slice %130 {offsets = [0, 0], sizes = [8, 32], strides = [1, 1]} : vector<32x32xf32> to vector<8x32xf32>
    %cst_63 = arith.constant dense<0.000000e+00> : vector<8x32xf32>
    %149 = tpu.matmul %147, %148, %cst_63 {dimension_numbers = #tpu.dot_dimension_numbers<[1], [0], [0], [1], [0, 0, 1, 1], [], []>} : vector<8x8xf32>, vector<8x32xf32>, vector<8x32xf32> -> vector<8x32xf32>
    %150 = vector.extract_strided_slice %122 {offsets = [0, 8], sizes = [8, 8], strides = [1, 1]} : vector<8x32xf32> to vector<8x8xf32>
    %151 = vector.extract_strided_slice %128 {offsets = [0, 8], sizes = [12, 8], strides = [1, 1]} : vector<12x32xf32> to vector<12x8xf32>
    %152 = vector.extract_strided_slice %129 {offsets = [0, 8], sizes = [12, 8], strides = [1, 1]} : vector<12x32xf32> to vector<12x8xf32>
    %cst_64 = arith.constant dense<0.000000e+00> : vector<8x12xf32>
    %153 = tpu.matmul %150, %151, %cst_64 {dimension_numbers = #tpu.dot_dimension_numbers<[1], [1], [0], [0], [0, 0, 1, 0], [], []>} : vector<8x8xf32>, vector<12x8xf32>, vector<8x12xf32> -> vector<8x12xf32>
    %cst_65 = arith.constant 0.353553385 : f32
    %154 = vector.broadcast %cst_65 : f32 to vector<8x12xf32>
    %155 = arith.mulf %153, %154 : vector<8x12xf32>
    %cst_66 = arith.constant dense<0xFF800000> : vector<8xf32>
    %156 = vector.multi_reduction <maximumf>, %155, %cst_66 [1] : vector<8x12xf32> to vector<8xf32>
    %157 = vector.shape_cast %156 : vector<8xf32> to vector<8x1xf32>
    %158 = vector.broadcast %157 : vector<8x1xf32> to vector<8x12xf32>
    %159 = arith.subf %155, %158 : vector<8x12xf32>
    %160 = math.exp %159 : vector<8x12xf32>
    %cst_67 = arith.constant dense<0.000000e+00> : vector<8xf32>
    %161 = vector.multi_reduction <add>, %160, %cst_67 [1] : vector<8x12xf32> to vector<8xf32>
    %162 = vector.shape_cast %161 : vector<8xf32> to vector<8x1xf32>
    %163 = tpu.reciprocal %162 {approx = true} : vector<8x1xf32> -> vector<8x1xf32>
    %164 = vector.broadcast %163 : vector<8x1xf32> to vector<8x12xf32>
    %165 = arith.mulf %160, %164 : vector<8x12xf32>
    %cst_68 = arith.constant dense<0.000000e+00> : vector<8x8xf32>
    %166 = tpu.matmul %165, %152, %cst_68 {dimension_numbers = #tpu.dot_dimension_numbers<[1], [0], [0], [1], [0, 0, 1, 1], [], []>} : vector<8x12xf32>, vector<12x8xf32>, vector<8x8xf32> -> vector<8x8xf32>
    %167 = vector.extract_strided_slice %130 {offsets = [8, 0], sizes = [8, 32], strides = [1, 1]} : vector<32x32xf32> to vector<8x32xf32>
    %cst_69 = arith.constant dense<0.000000e+00> : vector<8x32xf32>
    %168 = tpu.matmul %166, %167, %cst_69 {dimension_numbers = #tpu.dot_dimension_numbers<[1], [0], [0], [1], [0, 0, 1, 1], [], []>} : vector<8x8xf32>, vector<8x32xf32>, vector<8x32xf32> -> vector<8x32xf32>
    %169 = arith.addf %149, %168 : vector<8x32xf32>
    %170 = vector.extract_strided_slice %122 {offsets = [0, 16], sizes = [8, 8], strides = [1, 1]} : vector<8x32xf32> to vector<8x8xf32>
    %171 = vector.extract_strided_slice %128 {offsets = [0, 16], sizes = [12, 8], strides = [1, 1]} : vector<12x32xf32> to vector<12x8xf32>
    %172 = vector.extract_strided_slice %129 {offsets = [0, 16], sizes = [12, 8], strides = [1, 1]} : vector<12x32xf32> to vector<12x8xf32>
    %cst_70 = arith.constant dense<0.000000e+00> : vector<8x12xf32>
    %173 = tpu.matmul %170, %171, %cst_70 {dimension_numbers = #tpu.dot_dimension_numbers<[1], [1], [0], [0], [0, 0, 1, 0], [], []>} : vector<8x8xf32>, vector<12x8xf32>, vector<8x12xf32> -> vector<8x12xf32>
    %cst_71 = arith.constant 0.353553385 : f32
    %174 = vector.broadcast %cst_71 : f32 to vector<8x12xf32>
    %175 = arith.mulf %173, %174 : vector<8x12xf32>
    %cst_72 = arith.constant dense<0xFF800000> : vector<8xf32>
    %176 = vector.multi_reduction <maximumf>, %175, %cst_72 [1] : vector<8x12xf32> to vector<8xf32>
    %177 = vector.shape_cast %176 : vector<8xf32> to vector<8x1xf32>
    %178 = vector.broadcast %177 : vector<8x1xf32> to vector<8x12xf32>
    %179 = arith.subf %175, %178 : vector<8x12xf32>
    %180 = math.exp %179 : vector<8x12xf32>
    %cst_73 = arith.constant dense<0.000000e+00> : vector<8xf32>
    %181 = vector.multi_reduction <add>, %180, %cst_73 [1] : vector<8x12xf32> to vector<8xf32>
    %182 = vector.shape_cast %181 : vector<8xf32> to vector<8x1xf32>
    %183 = tpu.reciprocal %182 {approx = true} : vector<8x1xf32> -> vector<8x1xf32>
    %184 = vector.broadcast %183 : vector<8x1xf32> to vector<8x12xf32>
    %185 = arith.mulf %180, %184 : vector<8x12xf32>
    %cst_74 = arith.constant dense<0.000000e+00> : vector<8x8xf32>
    %186 = tpu.matmul %185, %172, %cst_74 {dimension_numbers = #tpu.dot_dimension_numbers<[1], [0], [0], [1], [0, 0, 1, 1], [], []>} : vector<8x12xf32>, vector<12x8xf32>, vector<8x8xf32> -> vector<8x8xf32>
    %187 = vector.extract_strided_slice %130 {offsets = [16, 0], sizes = [8, 32], strides = [1, 1]} : vector<32x32xf32> to vector<8x32xf32>
    %cst_75 = arith.constant dense<0.000000e+00> : vector<8x32xf32>
    %188 = tpu.matmul %186, %187, %cst_75 {dimension_numbers = #tpu.dot_dimension_numbers<[1], [0], [0], [1], [0, 0, 1, 1], [], []>} : vector<8x8xf32>, vector<8x32xf32>, vector<8x32xf32> -> vector<8x32xf32>
    %189 = arith.addf %169, %188 : vector<8x32xf32>
    %190 = vector.extract_strided_slice %122 {offsets = [0, 24], sizes = [8, 8], strides = [1, 1]} : vector<8x32xf32> to vector<8x8xf32>
    %191 = vector.extract_strided_slice %128 {offsets = [0, 24], sizes = [12, 8], strides = [1, 1]} : vector<12x32xf32> to vector<12x8xf32>
    %192 = vector.extract_strided_slice %129 {offsets = [0, 24], sizes = [12, 8], strides = [1, 1]} : vector<12x32xf32> to vector<12x8xf32>
    %cst_76 = arith.constant dense<0.000000e+00> : vector<8x12xf32>
    %193 = tpu.matmul %190, %191, %cst_76 {dimension_numbers = #tpu.dot_dimension_numbers<[1], [1], [0], [0], [0, 0, 1, 0], [], []>} : vector<8x8xf32>, vector<12x8xf32>, vector<8x12xf32> -> vector<8x12xf32>
    %cst_77 = arith.constant 0.353553385 : f32
    %194 = vector.broadcast %cst_77 : f32 to vector<8x12xf32>
    %195 = arith.mulf %193, %194 : vector<8x12xf32>
    %cst_78 = arith.constant dense<0xFF800000> : vector<8xf32>
    %196 = vector.multi_reduction <maximumf>, %195, %cst_78 [1] : vector<8x12xf32> to vector<8xf32>
    %197 = vector.shape_cast %196 : vector<8xf32> to vector<8x1xf32>
    %198 = vector.broadcast %197 : vector<8x1xf32> to vector<8x12xf32>
    %199 = arith.subf %195, %198 : vector<8x12xf32>
    %200 = math.exp %199 : vector<8x12xf32>
    %cst_79 = arith.constant dense<0.000000e+00> : vector<8xf32>
    %201 = vector.multi_reduction <add>, %200, %cst_79 [1] : vector<8x12xf32> to vector<8xf32>
    %202 = vector.shape_cast %201 : vector<8xf32> to vector<8x1xf32>
    %203 = tpu.reciprocal %202 {approx = true} : vector<8x1xf32> -> vector<8x1xf32>
    %204 = vector.broadcast %203 : vector<8x1xf32> to vector<8x12xf32>
    %205 = arith.mulf %200, %204 : vector<8x12xf32>
    %cst_80 = arith.constant dense<0.000000e+00> : vector<8x8xf32>
    %206 = tpu.matmul %205, %192, %cst_80 {dimension_numbers = #tpu.dot_dimension_numbers<[1], [0], [0], [1], [0, 0, 1, 1], [], []>} : vector<8x12xf32>, vector<12x8xf32>, vector<8x8xf32> -> vector<8x8xf32>
    %207 = vector.extract_strided_slice %130 {offsets = [24, 0], sizes = [8, 32], strides = [1, 1]} : vector<32x32xf32> to vector<8x32xf32>
    %cst_81 = arith.constant dense<0.000000e+00> : vector<8x32xf32>
    %208 = tpu.matmul %206, %207, %cst_81 {dimension_numbers = #tpu.dot_dimension_numbers<[1], [0], [0], [1], [0, 0, 1, 1], [], []>} : vector<8x8xf32>, vector<8x32xf32>, vector<8x32xf32> -> vector<8x32xf32>
    %209 = arith.addf %189, %208 : vector<8x32xf32>
    %c0_82 = arith.constant 0 : index
    %c0_83 = arith.constant 0 : index
    %210 = vector.load %arg14[%c0_82, %c0_83] : memref<1x32xf32, #tpu.memory_space<vmem>>, vector<1x32xf32>
    %211 = vector.broadcast %210 : vector<1x32xf32> to vector<8x32xf32>
    %212 = arith.addf %209, %211 : vector<8x32xf32>
    %213 = arith.addf %117, %212 : vector<8x32xf32>
    %c0_84 = arith.constant 0 : index
    %c0_85 = arith.constant 0 : index
    %214 = vector.load %arg15[%c0_84, %c0_85] : memref<1x32xf32, #tpu.memory_space<vmem>>, vector<1x32xf32>
    %c0_86 = arith.constant 0 : index
    %c0_87 = arith.constant 0 : index
    %215 = vector.load %arg16[%c0_86, %c0_87] : memref<1x32xf32, #tpu.memory_space<vmem>>, vector<1x32xf32>
    %cst_88 = arith.constant dense<0.000000e+00> : vector<8xf32>
    %216 = vector.multi_reduction <add>, %213, %cst_88 [1] : vector<8x32xf32> to vector<8xf32>
    %217 = vector.shape_cast %216 : vector<8xf32> to vector<8x1xf32>
    %cst_89 = arith.constant 3.200000e+01 : f32
    %218 = vector.broadcast %cst_89 : f32 to vector<8x1xf32>
    %219 = arith.divf %217, %218 : vector<8x1xf32>
    %220 = vector.broadcast %219 : vector<8x1xf32> to vector<8x32xf32>
    %221 = arith.subf %213, %220 : vector<8x32xf32>
    %222 = arith.mulf %221, %221 : vector<8x32xf32>
    %cst_90 = arith.constant dense<0.000000e+00> : vector<8xf32>
    %223 = vector.multi_reduction <add>, %222, %cst_90 [1] : vector<8x32xf32> to vector<8xf32>
    %224 = vector.shape_cast %223 : vector<8xf32> to vector<8x1xf32>
    %cst_91 = arith.constant 3.200000e+01 : f32
    %225 = vector.broadcast %cst_91 : f32 to vector<8x1xf32>
    %226 = arith.divf %224, %225 : vector<8x1xf32>
    %cst_92 = arith.constant 9.99999974E-6 : f32
    %227 = vector.broadcast %cst_92 : f32 to vector<8x1xf32>
    %228 = arith.addf %226, %227 : vector<8x1xf32>
    %229 = math.rsqrt %228 : vector<8x1xf32>
    %230 = vector.broadcast %229 : vector<8x1xf32> to vector<8x32xf32>
    %231 = arith.mulf %221, %230 : vector<8x32xf32>
    %232 = vector.broadcast %214 : vector<1x32xf32> to vector<8x32xf32>
    %233 = arith.mulf %231, %232 : vector<8x32xf32>
    %234 = vector.broadcast %215 : vector<1x32xf32> to vector<8x32xf32>
    %235 = arith.addf %233, %234 : vector<8x32xf32>
    %c0_93 = arith.constant 0 : index
    %c0_94 = arith.constant 0 : index
    %236 = vector.load %arg17[%c0_93, %c0_94] : memref<32x64xf32, #tpu.memory_space<vmem>>, vector<32x64xf32>
    %cst_95 = arith.constant dense<0.000000e+00> : vector<8x64xf32>
    %237 = tpu.matmul %235, %236, %cst_95 {dimension_numbers = #tpu.dot_dimension_numbers<[1], [0], [0], [1], [0, 0, 1, 1], [], []>} : vector<8x32xf32>, vector<32x64xf32>, vector<8x64xf32> -> vector<8x64xf32>
    %c0_96 = arith.constant 0 : index
    %c0_97 = arith.constant 0 : index
    %238 = vector.load %arg18[%c0_96, %c0_97] : memref<1x64xf32, #tpu.memory_space<vmem>>, vector<1x64xf32>
    %239 = vector.broadcast %238 : vector<1x64xf32> to vector<8x64xf32>
    %240 = arith.addf %237, %239 : vector<8x64xf32>
    %cst_98 = arith.constant 0.000000e+00 : f32
    %241 = vector.broadcast %cst_98 : f32 to vector<8x64xf32>
    %242 = arith.maximumf %240, %241 : vector<8x64xf32>
    %c0_99 = arith.constant 0 : index
    %c0_100 = arith.constant 0 : index
    %243 = vector.load %arg19[%c0_99, %c0_100] : memref<64x32xf32, #tpu.memory_space<vmem>>, vector<64x32xf32>
    %cst_101 = arith.constant dense<0.000000e+00> : vector<8x32xf32>
    %244 = tpu.matmul %242, %243, %cst_101 {dimension_numbers = #tpu.dot_dimension_numbers<[1], [0], [0], [1], [0, 0, 1, 1], [], []>} : vector<8x64xf32>, vector<64x32xf32>, vector<8x32xf32> -> vector<8x32xf32>
    %c0_102 = arith.constant 0 : index
    %c0_103 = arith.constant 0 : index
    %245 = vector.load %arg20[%c0_102, %c0_103] : memref<1x32xf32, #tpu.memory_space<vmem>>, vector<1x32xf32>
    %246 = vector.broadcast %245 : vector<1x32xf32> to vector<8x32xf32>
    %247 = arith.addf %244, %246 : vector<8x32xf32>
    %248 = arith.addf %235, %247 : vector<8x32xf32>
    %c0_104 = arith.constant 0 : index
    %c0_105 = arith.constant 0 : index
    %249 = vector.load %arg21[%c0_104, %c0_105] : memref<1x32xf32, #tpu.memory_space<vmem>>, vector<1x32xf32>
    %c0_106 = arith.constant 0 : index
    %c0_107 = arith.constant 0 : index
    %250 = vector.load %arg22[%c0_106, %c0_107] : memref<1x32xf32, #tpu.memory_space<vmem>>, vector<1x32xf32>
    %cst_108 = arith.constant dense<0.000000e+00> : vector<8xf32>
    %251 = vector.multi_reduction <add>, %248, %cst_108 [1] : vector<8x32xf32> to vector<8xf32>
    %252 = vector.shape_cast %251 : vector<8xf32> to vector<8x1xf32>
    %cst_109 = arith.constant 3.200000e+01 : f32
    %253 = vector.broadcast %cst_109 : f32 to vector<8x1xf32>
    %254 = arith.divf %252, %253 : vector<8x1xf32>
    %255 = vector.broadcast %254 : vector<8x1xf32> to vector<8x32xf32>
    %256 = arith.subf %248, %255 : vector<8x32xf32>
    %257 = arith.mulf %256, %256 : vector<8x32xf32>
    %cst_110 = arith.constant dense<0.000000e+00> : vector<8xf32>
    %258 = vector.multi_reduction <add>, %257, %cst_110 [1] : vector<8x32xf32> to vector<8xf32>
    %259 = vector.shape_cast %258 : vector<8xf32> to vector<8x1xf32>
    %cst_111 = arith.constant 3.200000e+01 : f32
    %260 = vector.broadcast %cst_111 : f32 to vector<8x1xf32>
    %261 = arith.divf %259, %260 : vector<8x1xf32>
    %cst_112 = arith.constant 9.99999974E-6 : f32
    %262 = vector.broadcast %cst_112 : f32 to vector<8x1xf32>
    %263 = arith.addf %261, %262 : vector<8x1xf32>
    %264 = math.rsqrt %263 : vector<8x1xf32>
    %265 = vector.broadcast %264 : vector<8x1xf32> to vector<8x32xf32>
    %266 = arith.mulf %256, %265 : vector<8x32xf32>
    %267 = vector.broadcast %249 : vector<1x32xf32> to vector<8x32xf32>
    %268 = arith.mulf %266, %267 : vector<8x32xf32>
    %269 = vector.broadcast %250 : vector<1x32xf32> to vector<8x32xf32>
    %270 = arith.addf %268, %269 : vector<8x32xf32>
    %c0_113 = arith.constant 0 : index
    %c0_114 = arith.constant 0 : index
    %c0_115 = arith.constant 0 : index
    %271 = vector.load %arg23[%c0_113, %c0_114, %c0_115] : memref<1x8x32xf32, #tpu.memory_space<vmem>>, vector<1x8x32xf32>
    %272 = vector.shape_cast %271 : vector<1x8x32xf32> to vector<8x32xf32>
    %273 = vector.shape_cast %270 : vector<8x32xf32> to vector<1x8x32xf32>
    tpu.vector_store %arg23[%c0_113, %c0_114, %c0_115], %273 {strides = array<i32>} : memref<1x8x32xf32, #tpu.memory_space<vmem>>, vector<1x8x32xf32>,
    return
  }
  func.func @transform_0(%arg0: i32) -> (i32, i32, i32) {
    %c0_i32 = arith.constant 0 : i32
    %c0_i32_0 = arith.constant 0 : i32
    %c0_i32_1 = arith.constant 0 : i32
    return %arg0, %c0_i32, %c0_i32_0 : i32, i32, i32
  }
  func.func @transform_1(%arg0: i32) -> (i32, i32, i32) {
    %c0_i32 = arith.constant 0 : i32
    %c0_i32_0 = arith.constant 0 : i32
    %c0_i32_1 = arith.constant 0 : i32
    return %arg0, %c0_i32, %c0_i32_0 : i32, i32, i32
  }
  func.func @transform_2(%arg0: i32) -> (i32, i32) {
    %c0_i32 = arith.constant 0 : i32
    %c0_i32_0 = arith.constant 0 : i32
    %c0_i32_1 = arith.constant 0 : i32
    return %c0_i32, %c0_i32_0 : i32, i32
  }
  func.func @transform_3(%arg0: i32) -> (i32, i32) {
    %c0_i32 = arith.constant 0 : i32
    %c0_i32_0 = arith.constant 0 : i32
    %c0_i32_1 = arith.constant 0 : i32
    return %c0_i32, %c0_i32_0 : i32, i32
  }
  func.func @transform_4(%arg0: i32) -> (i32, i32) {
    %c0_i32 = arith.constant 0 : i32
    %c0_i32_0 = arith.constant 0 : i32
    %c0_i32_1 = arith.constant 0 : i32
    return %c0_i32, %c0_i32_0 : i32, i32
  }
  func.func @transform_5(%arg0: i32) -> (i32, i32) {
    %c0_i32 = arith.constant 0 : i32
    %c0_i32_0 = arith.constant 0 : i32
    %c0_i32_1 = arith.constant 0 : i32
    return %c0_i32, %c0_i32_0 : i32, i32
  }
  func.func @transform_6(%arg0: i32) -> (i32, i32) {
    %c0_i32 = arith.constant 0 : i32
    %c0_i32_0 = arith.constant 0 : i32
    %c0_i32_1 = arith.constant 0 : i32
    return %c0_i32, %c0_i32_0 : i32, i32
  }
  func.func @transform_7(%arg0: i32) -> (i32, i32) {
    %c0_i32 = arith.constant 0 : i32
    %c0_i32_0 = arith.constant 0 : i32
    %c0_i32_1 = arith.constant 0 : i32
    return %c0_i32, %c0_i32_0 : i32, i32
  }
  func.func @transform_8(%arg0: i32) -> (i32, i32) {
    %c0_i32 = arith.constant 0 : i32
    %c0_i32_0 = arith.constant 0 : i32
    %c0_i32_1 = arith.constant 0 : i32
    return %c0_i32, %c0_i32_0 : i32, i32
  }
  func.func @transform_9(%arg0: i32) -> (i32, i32) {
    %c0_i32 = arith.constant 0 : i32
    %c0_i32_0 = arith.constant 0 : i32
    %c0_i32_1 = arith.constant 0 : i32
    return %c0_i32, %c0_i32_0 : i32, i32
  }
  func.func @transform_10(%arg0: i32) -> (i32, i32) {
    %c0_i32 = arith.constant 0 : i32
    %c0_i32_0 = arith.constant 0 : i32
    %c0_i32_1 = arith.constant 0 : i32
    return %c0_i32, %c0_i32_0 : i32, i32
  }
  func.func @transform_11(%arg0: i32) -> (i32, i32) {
    %c0_i32 = arith.constant 0 : i32
    %c0_i32_0 = arith.constant 0 : i32
    %c0_i32_1 = arith.constant 0 : i32
    return %c0_i32, %c0_i32_0 : i32, i32
  }
  func.func @transform_12(%arg0: i32) -> (i32, i32) {
    %c0_i32 = arith.constant 0 : i32
    %c0_i32_0 = arith.constant 0 : i32
    %c0_i32_1 = arith.constant 0 : i32
    return %c0_i32, %c0_i32_0 : i32, i32
  }
  func.func @transform_13(%arg0: i32) -> (i32, i32) {
    %c0_i32 = arith.constant 0 : i32
    %c0_i32_0 = arith.constant 0 : i32
    %c0_i32_1 = arith.constant 0 : i32
    return %c0_i32, %c0_i32_0 : i32, i32
  }
  func.func @transform_14(%arg0: i32) -> (i32, i32) {
    %c0_i32 = arith.constant 0 : i32
    %c0_i32_0 = arith.constant 0 : i32
    %c0_i32_1 = arith.constant 0 : i32
    return %c0_i32, %c0_i32_0 : i32, i32
  }
  func.func @transform_15(%arg0: i32) -> (i32, i32) {
    %c0_i32 = arith.constant 0 : i32
    %c0_i32_0 = arith.constant 0 : i32
    %c0_i32_1 = arith.constant 0 : i32
    return %c0_i32, %c0_i32_0 : i32, i32
  }
  func.func @transform_16(%arg0: i32) -> (i32, i32) {
    %c0_i32 = arith.constant 0 : i32
    %c0_i32_0 = arith.constant 0 : i32
    %c0_i32_1 = arith.constant 0 : i32
    return %c0_i32, %c0_i32_0 : i32, i32
  }
  func.func @transform_17(%arg0: i32) -> (i32, i32) {
    %c0_i32 = arith.constant 0 : i32
    %c0_i32_0 = arith.constant 0 : i32
    %c0_i32_1 = arith.constant 0 : i32
    return %c0_i32, %c0_i32_0 : i32, i32
  }
  func.func @transform_18(%arg0: i32) -> (i32, i32) {
    %c0_i32 = arith.constant 0 : i32
    %c0_i32_0 = arith.constant 0 : i32
    %c0_i32_1 = arith.constant 0 : i32
    return %c0_i32, %c0_i32_0 : i32, i32
  }
  func.func @transform_19(%arg0: i32) -> (i32, i32) {
    %c0_i32 = arith.constant 0 : i32
    %c0_i32_0 = arith.constant 0 : i32
    %c0_i32_1 = arith.constant 0 : i32
    return %c0_i32, %c0_i32_0 : i32, i32
  }
  func.func @transform_20(%arg0: i32) -> (i32, i32) {
    %c0_i32 = arith.constant 0 : i32
    %c0_i32_0 = arith.constant 0 : i32
    %c0_i32_1 = arith.constant 0 : i32
    return %c0_i32, %c0_i32_0 : i32, i32
  }
  func.func @transform_21(%arg0: i32) -> (i32, i32) {
    %c0_i32 = arith.constant 0 : i32
    %c0_i32_0 = arith.constant 0 : i32
    %c0_i32_1 = arith.constant 0 : i32
    return %c0_i32, %c0_i32_0 : i32, i32
  }
  func.func @transform_22(%arg0: i32) -> (i32, i32, i32) {
    %c0_i32 = arith.constant 0 : i32
    %c0_i32_0 = arith.constant 0 : i32
    %c0_i32_1 = arith.constant 0 : i32
    return %arg0, %c0_i32, %c0_i32_0 : i32, i32, i32
  }
}

</mosaic_0001>

<bundles_post_ra>
// kernel: simple_decoder_layer.1
= control target key start
LH: loop header
LB: loop body
LE: loop exit
PB: predicated region body
PF: predicated region fallthrough
CT: control target
= control target key end

     0   :  { %s4786_s0 = inlined_call_operand.vmem [shape: f32[2,8,32], index: 0, kind: input, shape index: {}]   ;;  %s4787_s1 = inlined_call_operand.vmem [shape: f32[2,12,32], index: 1, kind: input, shape index: {}]   ;;  %s4788_s2 = inlined_call_operand.vmem [shape: f32[32,96], index: 2, kind: input, shape index: {}]   ;;  %s4789_s3 = inlined_call_operand.vmem [shape: f32[1,96], index: 3, kind: input, shape index: {}]   ;;  %s4790_s4 = inlined_call_operand.vmem [shape: f32[32,32], index: 4, kind: input, shape index: {}]   ;;  %s4791_s5 = inlined_call_operand.hbm [shape: f32[1,32], index: 5, kind: input, shape index: {}]   ;;  %s4792_s6 = inlined_call_operand.hbm [shape: f32[1,32], index: 6, kind: input, shape index: {}]   ;;  %s4793_s7 = inlined_call_operand.hbm [shape: f32[1,32], index: 7, kind: input, shape index: {}]   ;;  %s4794_s8 = inlined_call_operand.vmem [shape: f32[32,32], index: 8, kind: input, shape index: {}]   ;;  %s4795_s9 = inlined_call_operand.hbm [shape: f32[1,32], index: 9, kind: input, shape index: {}]   ;;  %s4796_s10 = inlined_call_operand.vmem [shape: f32[32,64], index: 10, kind: input, shape index: {}]   ;;  %s4797_s11 = inlined_call_operand.hbm [shape: f32[1,64], index: 11, kind: input, shape index: {}]   ;;  %s4798_s12 = inlined_call_operand.vmem [shape: f32[32,32], index: 12, kind: input, shape index: {}]   ;;  %s4799_s13 = inlined_call_operand.vmem [shape: f32[1,32], index: 13, kind: input, shape index: {}]   ;;  %s4800_s14 = inlined_call_operand.vmem [shape: f32[1,32], index: 14, kind: input, shape index: {}]   ;;  %s4801_s15 = inlined_call_operand.vmem [shape: f32[1,32], index: 15, kind: input, shape index: {}]   ;;  %s4802_s16 = inlined_call_operand.vmem [shape: f32[32,64], index: 16, kind: input, shape index: {}]   ;;  %s4803_s17 = inlined_call_operand.vmem [shape: f32[1,64], index: 17, kind: input, shape index: {}]   ;;  %s4804_s18 = inlined_call_operand.vmem [shape: f32[64,32], index: 18, kind: input, shape index: {}]   ;;  %s4805_s19 = inlined_call_operand.vmem [shape: f32[1,32], index: 19, kind: input, shape index: {}]   ;;  %s4806_s20 = inlined_call_operand.vmem [shape: f32[1,32], index: 20, kind: input, shape index: {}]   ;;  %s4807_s21 = inlined_call_operand.vmem [shape: f32[1,32], index: 21, kind: input, shape index: {}]   ;;  %s4808_s22 = inlined_call_operand.vmem [shape: f32[2,8,32], index: 22, kind: output, shape index: {}]  }
   0x1   :  { %4823 = sst [smem:[#allocation14_spill]] %s4786_s0 }
   0x2   :  { %4824 = sst [smem:[#allocation15_spill]] %s4787_s1 }
   0x3   :  { %4825 = sst [smem:[#allocation16_spill]] %s4788_s2 }
   0x4   :  { %4826 = sst [smem:[#allocation17_spill]] %s4789_s3 }
   0x5   :  { %4827 = sst [smem:[#allocation18_spill]] %s4790_s4 }
   0x6   :  { %4828 = sst [smem:[#allocation19_spill]] %s4791_s5 }
   0x7   :  { %4829 = sst [smem:[#allocation20_spill]] %s4792_s6 }
   0x8   :  { %4830 = sst [smem:[#allocation21_spill]] %s4806_s20 }
   0x9   :  { %4831 = sst [smem:[#allocation22_spill]] %s4807_s21 }
   0xa   :  { %4832 = sst [smem:[#allocation23_spill]] %s4808_s22 }
   0xb   :  { %27 = vsyncpa [#allocation3], 0 }
   0xc   :  { %28 = vsyncpa [#allocation5], 0 }
   0xd   :  { %29 = vsyncpa [#allocation8], 0  ;;  %s4256_s3 = smov 0  }
   0xe LB: > { %4833 = sst [smem:[#allocation13_spill]] %s4119_s3  ;;  %s4121_s28 = smov [#allocation4]   ;;  %s4119_s3 = sphi %s4256_s3, %s35_s3  }
   0xf   : > { %s571_s29 = sshll.u32 %s4121_s28, 4  ;;  %s4262_s30 = sadd.s32 4294967295, %s4119_s3   ;;  %s4267_s29 = int_to_ptr.vmem [resolvable:$true] %s571_s29 }
  0x10   : > { %p3380_p0 = scmp.ge.s32.totalorder %s4119_s3, 1  ;;  %p538_p1 = scmp.lt.s32.totalorder %s4119_s3, 3 }
  0x11   : > { %p4814_p2 = scmp.eq.s32.totalorder %s4262_s30, 0  ;;  %s4122_s0 = smov [#allocation7]  }
  0x12   : > { %p4269_p3 = pnand %p3380_p0, %p538_p1  ;;  %s596_s23 = sshll.u32 %s4122_s0, 4  ;;  %s4275_s23 = int_to_ptr.vmem [resolvable:$true] %s596_s23 }
  0x13   : > { %s4123_s1 = smov [#allocation2]   ;;  %s4124_s6 = smov [#allocation6]  }
  0x14   : > { %s4834_s4 = scalar_select %p4269_p3, 1, 0 }
  0x15   : > { %p3834_p4 = pneg %p4269_p3  ;;  %s560_s5 = sshll.u32 %s4123_s1, 4  ;;  %s4283_s5 = int_to_ptr.vmem [resolvable:$true] %s560_s5 }
  0x16   : > { %s582_s25 = sshll.u32 %s4124_s6, 4  ;;  %s4836_s27 = sld [smem:[#allocation20_spill]]  ;;  %s4285_s25 = int_to_ptr.vmem [resolvable:$true] %s582_s25 }
  0x17   : > { %p4279_p5 = pnand %p4814_p2, %p3834_p4 }
  0x19   : > { %p4295_p7 = pneg %p4279_p5 }
  0x1c   : > { %s3961_s28 = scalar_lea.hbm %s4836_s27, 16 }
  0x1d   : > { %p3962_p6 = scmp.ne.s32.totalorder %s4836_s27, %s3961_s28  ;;  %p3968_p10 = scmp.lt.u32.totalorder %s3961_s28, %s4836_s27 }
  0x1f   : > { %p3964_p8 = pnand %p4295_p7, %p3962_p6 }
  0x21   : > { %p3965_p9 = pneg %p3964_p8 }
  0x23   : > { %p3970_p11 = pnand %p3968_p10, %p3965_p9 }
  0x25   : > { %3973 = shalt.err (!%p3970_p11)
}
  0x26   : > { %s3974_s3 = scalar_lea.vmem %s4267_s29, 16  ;;  %s3981_s26 = scalar_lea.vmem %s4267_s29, 32 }
  0x27   : > { %p3975_p12 = scmp.ne.s32.totalorder %s4267_s29, %s3974_s3  ;;  %p3982_p1 = scmp.lt.s32.totalorder %s4267_s29, %s4267_s29 }
  0x28   : > { %p3983_p4 = scmp.lt.s32.totalorder %s3981_s26, %s3974_s3 }
  0x29   : > { %p3977_p13 = pnand %p3975_p12, %p4295_p7 }
  0x2a   : > { %p3984_p6 = por %p3983_p4, %p3982_p1 }
  0x2b   : > { %p3978_p0 = pneg %p3977_p13 }
  0x2d   : > { %p3985_p8 = pnand %p3984_p6, %p3978_p0 }
  0x2f   : > { %3988 = shalt.err (!%p3985_p8)
}
  0x30   : > { %3840 = dma.hbm_to_vmem [thread:$0]  (!%p4279_p5), %s4836_s27, 16, %s4267_s29, [#allocation5]  }
  0x31   : > { %s3989_s6 = scalar_lea.hbm %s4795_s9, 16 }
  0x32   : > { %p3990_p9 = scmp.ne.s32.totalorder %s4795_s9, %s3989_s6  ;;  %p3996_p12 = scmp.lt.u32.totalorder %s3989_s6, %s4795_s9 }
  0x34   : > { %p3992_p10 = pnand %p3990_p9, %p4295_p7 }
  0x36   : > { %p3993_p11 = pneg %p3992_p10 }
  0x38   : > { %p3998_p13 = pnand %p3996_p12, %p3993_p11 }
  0x3a   : > { %4001 = shalt.err (!%p3998_p13)
}
  0x3b   : > { %s4002_s29 = scalar_lea.vmem %s4275_s23, 16  ;;  %s4009_s20 = scalar_lea.vmem %s4275_s23, 32 }
  0x3c   : > { %p4003_p0 = scmp.ne.s32.totalorder %s4275_s23, %s4002_s29  ;;  %p4010_p6 = scmp.lt.s32.totalorder %s4275_s23, %s4275_s23 }
  0x3d   : > { %p4011_p8 = scmp.lt.s32.totalorder %s4009_s20, %s4002_s29 }
  0x3e   : > { %p4005_p1 = pnand %p4003_p0, %p4295_p7 }
  0x3f   : > { %p4012_p9 = por %p4011_p8, %p4010_p6 }
  0x40   : > { %p4006_p4 = pneg %p4005_p1 }
  0x42   : > { %p4013_p10 = pnand %p4012_p9, %p4006_p4 }
  0x44   : > { %4016 = shalt.err (!%p4013_p10)
}
  0x45   : > { %3846 = dma.hbm_to_vmem [thread:$0]  (!%p4279_p5), %s4795_s9, 16, %s4275_s23, [#allocation8]  }
  0x46   : > { %s4838_s0 = sld [smem:[#allocation19_spill]] }
  0x4c   : > { %s4017_s6 = scalar_lea.hbm %s4838_s0, 16 }
  0x4d   : > { %p4018_p11 = scmp.ne.s32.totalorder %s4838_s0, %s4017_s6  ;;  %p4024_p0 = scmp.lt.u32.totalorder %s4017_s6, %s4838_s0 }
  0x4f   : > { %p4020_p12 = pnand %p4018_p11, %p4295_p7 }
  0x51   : > { %p4021_p13 = pneg %p4020_p12 }
  0x53   : > { %p4026_p1 = pnand %p4024_p0, %p4021_p13 }
  0x55   : > { %4029 = shalt.err (!%p4026_p1)
}
  0x56   : > { %s4030_s23 = scalar_lea.vmem %s4283_s5, 16  ;;  %s4037_s21 = scalar_lea.vmem %s4283_s5, 32 }
  0x57   : > { %p4031_p4 = scmp.ne.s32.totalorder %s4283_s5, %s4030_s23  ;;  %p4038_p9 = scmp.lt.s32.totalorder %s4283_s5, %s4283_s5 }
  0x58   : > { %p4039_p10 = scmp.lt.s32.totalorder %s4037_s21, %s4030_s23 }
  0x59   : > { %p4033_p6 = pnand %p4031_p4, %p4295_p7 }
  0x5a   : > { %p4040_p11 = por %p4039_p10, %p4038_p9 }
  0x5b   : > { %p4034_p8 = pneg %p4033_p6 }
  0x5d   : > { %p4041_p12 = pnand %p4040_p11, %p4034_p8 }
  0x5f   : > { %4044 = shalt.err (!%p4041_p12)
}
  0x60   : > { %3837 = dma.hbm_to_vmem [thread:$0]  (!%p4279_p5), %s4838_s0, 16, %s4283_s5, [#allocation3]  }
  0x61   : > { %s4045_s3 = scalar_lea.hbm %s4793_s7, 16 }
  0x62   : > { %p4046_p13 = scmp.ne.s32.totalorder %s4793_s7, %s4045_s3  ;;  %p4052_p4 = scmp.lt.u32.totalorder %s4045_s3, %s4793_s7 }
  0x64   : > { %p4048_p0 = pnand %p4046_p13, %p4295_p7 }
  0x66   : > { %p4049_p1 = pneg %p4048_p0 }
  0x68   : > { %p4054_p6 = pnand %p4052_p4, %p4049_p1 }
  0x6a   : > { %4057 = shalt.err (!%p4054_p6)
}
  0x6b   : > { %s4058_s5 = scalar_lea.vmem %s4285_s25, 16  ;;  %s4065_s21 = scalar_lea.vmem %s4285_s25, 32 }
  0x6c   : > { %p4059_p8 = scmp.ne.s32.totalorder %s4285_s25, %s4058_s5  ;;  %p4066_p11 = scmp.lt.s32.totalorder %s4285_s25, %s4285_s25 }
  0x6d   : > { %p4067_p12 = scmp.lt.s32.totalorder %s4065_s21, %s4058_s5 }
  0x6e   : > { %p4061_p9 = pnand %p4059_p8, %p4295_p7 }
  0x6f   : > { %p4068_p13 = por %p4067_p12, %p4066_p11 }
  0x70   : > { %p4062_p10 = pneg %p4061_p9 }
  0x72   : > { %p4069_p0 = pnand %p4068_p13, %p4062_p10 }
  0x74   : > { %4072 = shalt.err (!%p4069_p0)
}
  0x75   : > { %3843 = dma.hbm_to_vmem [thread:$0]  (!%p4279_p5), %s4793_s7, 16, %s4285_s25, [#allocation5]  }
  0x76   : > { %s4125_s28 = smov [#allocation9]   ;;  %s4073_s29 = scalar_lea.hbm %s4797_s11, 16 }
  0x77   : > { %s610_s6 = sshll.u32 %s4125_s28, 4  ;;  %p4074_p1 = scmp.ne.s32.totalorder %s4797_s11, %s4073_s29  ;;  %s611_s6 = int_to_ptr.vmem [resolvable:$true] %s610_s6 }
  0x78   : > { %p4080_p8 = scmp.lt.u32.totalorder %s4073_s29, %s4797_s11 }
  0x79   : > { %p4076_p4 = pnand %p4074_p1, %p4295_p7 }
  0x7b   : > { %p4077_p6 = pneg %p4076_p4 }
  0x7d   : > { %p4082_p9 = pnand %p4080_p8, %p4077_p6 }
  0x7f   : > { %4085 = shalt.err (!%p4082_p9)
}
  0x80   : > { %s4086_s25 = scalar_lea.vmem %s611_s6, 16  ;;  %s4093_s22 = scalar_lea.vmem %s611_s6, 32 }
  0x81   : > { %p4087_p10 = scmp.ne.s32.totalorder %s611_s6, %s4086_s25  ;;  %p4094_p13 = scmp.lt.s32.totalorder %s611_s6, %s611_s6 }
  0x82   : > { %p4095_p0 = scmp.lt.s32.totalorder %s4093_s22, %s4086_s25 }
  0x83   : > { %p4089_p11 = pnand %p4087_p10, %p4295_p7 }
  0x84   : > { %p4096_p2 = por %p4095_p0, %p4094_p13 }
  0x85   : > { %p4090_p12 = pneg %p4089_p11 }
  0x87   : > { %p4097_p3 = pnand %p4096_p2, %p4090_p12 }
  0x89   : > { %4100 = shalt.err (!%p4097_p3)
}
  0x8a   : > { %3849 = dma.hbm_to_vmem [thread:$0]  (!%p4279_p5), %s4797_s11, 16, %s611_s6, [#allocation8]  }
  0x8b   : > { %p4839_p1 = scmp.ne.s32.totalorder %s4834_s4, 0 }
  0x8c   : > { %p4840_p4 = scmp.eq.s32.totalorder (!%p4839_p1), %s4262_s30, 0 }
  0x8d   : > { %668 = sbr.rel (%p4839_p1) target bundleno = 6790 (0x1a86), region = 108 }
  0x94   : > { %4106 = dma.done.wait (%p4840_p4), [#allocation3], 16   ;;  %p4841_p7 = pmov %p4840_p4 }
  0x95   : > { %p4842_p6 = pmov %p4840_p4 }
  0x96   : > { %4108 = vsyncadd (%p4841_p7), [#allocation3], 4294967280 }
  0x97   : > { %4110 = dma.done.wait (%p4842_p6), [#allocation5], 32   ;;  %p4843_p2 = pmov %p4840_p4 }
  0x99   : > { %4112 = vsyncadd (%p4843_p2), [#allocation5], 4294967264  ;;  %p4844_p3 = pmov %p4843_p2 }
  0x9a   : > { %p4845_p5 = pmov %p4843_p2 }
  0x9b   : > { %4114 = dma.done.wait (%p4844_p3), [#allocation8], 32  }
  0x9c   : > { %4116 = vsyncadd (%p4845_p5), [#allocation8], 4294967264  ;;  %p749_p8 = scmp.lt.s32.totalorder %s4262_s30, 1  ;;  %v4126_v0 = vmov 0.0|0.0   ;;  %vm4127_vm0 = vmmov 0   ;;  %v4128_v1 = vmov 0.0  }
  0x9d   : > { %3744 = vmatprep.subr.bf16.mxu0 %v4126_v0  ;;  %3553 = vmatprep.mubr.msk.f32.mxu0 %vm4127_vm0, %v4128_v1  ;;  %s4846_s1 = sld [smem:[#allocation16_spill]]  ;;  %s4847_s22 = sld [smem:[#allocation14_spill]]  ;;  %vm776_vm1 = vcmask 261120   ;;  %vm857_vm2 = vcmask 64512   ;;  %vm2111_vm4 = vcmask 97280   ;;  %vm2131_vm5 = vcmask 1043456  }
  0x9e   : > { %3561 = vmatprep.subr.mxu1 %v4128_v1  ;;  %3563 = vmatprep.mubr.msk.f32.mxu1 %vm4127_vm0, %v4128_v1  ;;  %s4865_s30 = smov (!%p749_p8, %s4262_s30), 1  ;;  %s4848_s24 = sld [smem:[#allocation17_spill]]  ;;  %vm4596_vm3 = vmpackc.low %vm857_vm2, %vm857_vm2  ;;  %vm4140_vm6 = vmmov 1   ;;  %vm3158_vm8 = vcmask 523264  }
  0x9f   : > { %s4816_s5 = sshll.u32 %s4865_s30, 3  ;;  %s4129_s6 = smov 120   ;;  %vm4615_vm7 = vmpackc.low %vm2131_vm5, %vm4140_vm6 }
  0xa0   : > { %s4130_s3 = smov 96   ;;  %s4131_s26 = smov 88  }
  0xa1   : > { %s4132_s29 = smov 56   ;;  %s4133_s20 = smov 64  }
  0xa2   : > { %s4818_s23 = smov 80   ;;  %s4821_s21 = smov 112  }
  0xa3   : > { %v765_v2 = vld [vmem:[%s4846_s1] sm:$0xff]  ;;  %v766_v3 = vld [vmem:[%s4846_s1 + $0x8] sm:$0xff]  ;;  %v767_v4 = vld [vmem:[%s4846_s1 + $0x10] sm:$0xff]  ;;  %s752_s2 = scalar_lea.vmem %s4847_s22, %s4816_s5  ;;  %s4139_s28 = smov 40  }
  0xa4   : > { %v3745_v5 = vpack.c.bf16 %v766_v3, %v765_v2  ;;  %v768_v6 = vld [vmem:[%s4846_s1 + $0x18] sm:$0xff]  ;;  %v4450_v8 = vld [vmem:[%s752_s2] sm:$0xff]  ;;  %s4849_s2 = sld [smem:[#allocation18_spill]]  ;;  %s4855_s22 = smov 112  }
  0xa5   : > { %v3748_v7 = vpack.c.bf16 %v768_v6, %v767_v4  ;;  %v3397_v9 = vld [vmem:[%s4848_s24] ss:$0 sm:$0xff]  ;;  %s4817_s24 = smov 72   ;;  %s4857_s4 = smov 80  }
  0xa6   : > { %3746 = vmatpush3.bf16.msra.mxu0 %v3745_v5  ;;  %s4860_s25 = sld [smem:[#allocation22_spill]] }
  0xa7   : > { %3747 = vmatprep.subr.bf16.mxu0 %v4126_v0 }
  0xaa   : > { %3749 = vmatpush3.bf16.msra.mxu0 %v3748_v7  ;;  %v851_v34 = vld [vmem:[%s4849_s2 + $0x8] sm:$0xff]  ;;  %v850_v43 = vld [vmem:[%s4849_s2] sm:$0xff] }
  0xab   : > { %3556 = vmatprep.subr.mxu0 %v4128_v1 }
  0xad   : > { %3554 = vmatmul.mubr.msk.f32.vlgmr.msra.gmra.mrb[0].mxu0 %vm776_vm1, %v4450_v8 }
  0xae   : > { %3558 = vmatprep.mubr.msk.f32.mxu0 %vm4127_vm0, %v4128_v1 }
 0x180   : > { %v846_v10 = vpop.f32.mrb[0].mxu0 }
 0x181   : > { %v4460_v11 = vadd.f32 %v3397_v9, %v846_v10  ;;  %v3555_v12 = vpop.f32.mrb[1].mxu0  ;;  %v852_v9 = vld [vmem:[%s4849_s2 + $0x10] sm:$0xff] }
 0x183   : > { %1020 = vrot.lane.b32.xlu1 %v4460_v11, %s4129_s6  ;;  %855 = vrot.lane.b32.xlu0 %v4460_v11, %s4130_s3 }
 0x187   : > { %1022 = vrot.lane.b32.xlu0 %v4460_v11, %s4131_s26 }
 0x1f5   : > { %v856_v13 = vpop.permute.xlu0 %855  ;;  %v1021_v15 = vpop.permute.xlu1 %1020 }
 0x1f6   : > { %3557 = vmatpush3.xpose.msk.msra.mxu0 %vm857_vm2, %v856_v13 }
 0x1f7   : > { %3566 = vmatprep.subr.mxu0 %v4128_v1 }
 0x1f9   : > { %3559 = vmatmul.mubr.msk.f32.vlgmr.msra.gmra.mrb[2].mxu0 %vm857_vm2, %v4460_v11  ;;  %v1023_v14 = vpop.permute.xlu0 %1022 }
 0x1fa   : > { %3567 = vmatpush3.xpose.msk.msra.mxu0 %vm857_vm2, %v1023_v14  ;;  %3568 = vmatprep.mubr.msk.f32.mxu0 %vm4127_vm0, %v4128_v1 }
 0x1fb   : > { %3576 = vmatprep.subr.mxu0 %v4128_v1 }
 0x1fd   : > { %3569 = vmatmul.mubr.msk.f32.vlgmr.msra.gmra.mrb[4].mxu0 %vm857_vm2, %v1021_v15 }
 0x1fe   : > { %3578 = vmatprep.mubr.msk.f32.mxu0 %vm4127_vm0, %v4128_v1  ;;  %3577 = vmatpush3.msra.mxu0 %v851_v34 }
 0x1ff   : > { %3586 = vmatprep.subr.mxu0 %v4128_v1 }
 0x2cc   : > { %v928_v16 = vpop.f32.mrb[2].mxu0 }
 0x2cd   : > { %v932_v17 = vmul.f32 0.35355338, %v928_v16  ;;  %v3560_v18 = vpop.f32.mrb[3].mxu0 }
 0x2cf   : > { %v933_v19 = vsel %vm857_vm2, %v932_v17, -inf }
 0x2d0   : > { %934 = vmax.xlane.f32.xlu1 %v933_v19  ;;  %v1094_v20 = vpop.f32.mrb[4].mxu0 }
 0x2d1   : > { %v1098_v21 = vmul.f32 0.35355338, %v1094_v20  ;;  %v3570_v22 = vpop.f32.mrb[5].mxu0 }
 0x2d3   : > { %v1099_v23 = vsel %vm857_vm2, %v1098_v21, -inf }
 0x2d4   : > { %1100 = vmax.xlane.f32.xlu0 %v1099_v23  ;;  %v853_v23 = vld [vmem:[%s4849_s2 + $0x18] sm:$0xff] }
 0x35d   : > { %v935_v24 = vpop.xlane.xlu1 %934 }
 0x35e   : > { %v936_v25 = vsub.f32 %v932_v17, %v935_v24 }
 0x360   : > { %v937_v26 = vmul.f32 1.442695, %v936_v25 }
 0x361   : > { %v1101_v27 = vpop.xlane.xlu0 %1100 }
 0x362   : > { %3923 = vpow2.f32 %v937_v26  ;;  %v1102_v28 = vsub.f32 %v1098_v21, %v1101_v27 }
 0x364   : > { %v1103_v29 = vmul.f32 1.442695, %v1102_v28 }
 0x366   : > { %3925 = vpow2.f32 %v1103_v29 }
 0x36c   : > { %v3924_v30 = vpop.eup %3923 }
 0x36d   : > { %v939_v31 = vsel %vm857_vm2, %v3924_v30, 0.0 }
 0x36e   : > { %940 = vadd.xlane.f32.xlu0 %v939_v31 }
 0x370   : > { %v3926_v32 = vpop.eup %3925 }
 0x371   : > { %v1105_v33 = vsel %vm857_vm2, %v3926_v32, 0.0 }
 0x372   : > { %1106 = vadd.xlane.f32.xlu1 %v1105_v33 }
 0x383   : > { %1110 = vrot.lane.b32.xlu1 %v4460_v11, %s4132_s29  ;;  %s4819_s29 = smov 104  }
 0x384   : > { %944 = vrot.lane.b32.xlu0 %v4460_v11, %s4133_s20  ;;  %s4138_s20 = smov 48  }
 0x387   : > { %1334 = vrot.lane.b32.xlu1 %v4460_v11, %s4818_s23  ;;  %s4858_s23 = smov 72  }
 0x388   : > { %1332 = vrot.lane.b32.xlu0 %v4460_v11, %s4821_s21  ;;  %s4850_s21 = sld [smem:[#allocation15_spill]] }
 0x3fb   : > { %v941_v35 = vpop.xlane.xlu0 %940 }
 0x3fc   : > { %3927 = vrcp.f32 %v941_v35 }
 0x3ff   : > { %v1107_v36 = vpop.xlane.xlu1 %1106  ;;  %v945_v37 = vpop.permute.xlu0 %944 }
 0x400   : > { %3929 = vrcp.f32 %v1107_v36  ;;  %3562 = vmatpush3.msra.mxu1 %v945_v37 }
 0x401   : > { %3571 = vmatprep.subr.mxu1 %v4128_v1 }
 0x403   : > { %v1111_v40 = vpop.permute.xlu1 %1110  ;;  %v1333_v49 = vpop.permute.xlu0 %1332 }
 0x406   : > { %v3928_v38 = vpop.eup %3927 }
 0x407   : > { %v943_v39 = vmul.f32 %v3928_v38, %v3924_v30  ;;  %v1335_v47 = vpop.permute.xlu1 %1334 }
 0x409   : > { %3564 = vmatmul.mubr.msk.f32.vlgmr.msra.gmra.mrb[0].mxu1 %vm857_vm2, %v943_v39 }
 0x40a   : > { %v3930_v41 = vpop.eup %3929  ;;  %3572 = vmatpush3.msra.mxu1 %v1111_v40  ;;  %3573 = vmatprep.mubr.msk.f32.mxu1 %vm4127_vm0, %v4128_v1 }
 0x40b   : > { %v1109_v42 = vmul.f32 %v3930_v41, %v3926_v32  ;;  %3581 = vmatprep.subr.mxu1 %v4128_v1  ;;  %v3415_v32 = vld [vmem:[#allocation2] ss:$0 sm:$0xff] }
 0x40d   : > { %3574 = vmatmul.mubr.msk.f32.vlgmr.msra.gmra.mrb[2].mxu1 %vm857_vm2, %v1109_v42 }
 0x40e   : > { %3583 = vmatprep.mubr.msk.f32.mxu1 %vm4127_vm0, %v4128_v1  ;;  %3582 = vmatpush3.msra.mxu1 %v850_v43  ;;  %v1935_v43 = vld [vmem:[%s4796_s10] sm:$0xff] }
 0x40f   : > { %3591 = vmatprep.subr.mxu1 %v4128_v1 }
 0x4dc   : > { %v1016_v44 = vpop.f32.mrb[0].mxu1 }
 0x4dd   : > { %v3565_v45 = vpop.f32.mrb[1].mxu1  ;;  %3584 = vmatmul.mubr.msk.f32.vlgmr.msra.gmra.mrb[4].mxu1 %vm857_vm2, %v1016_v44  ;;  %v1936_v44 = vld [vmem:[%s4796_s10 + $0x8] sm:$0xff] }
 0x4de   : > { %3593 = vmatprep.mubr.msk.f32.mxu1 %vm4127_vm0, %v4128_v1  ;;  %v1937_v45 = vld [vmem:[%s4796_s10 + $0x10] sm:$0xff] }
 0x4e0   : > { %v1182_v46 = vpop.f32.mrb[2].mxu1 }
 0x4e1   : > { %v3575_v48 = vpop.f32.mrb[3].mxu1  ;;  %3579 = vmatmul.mubr.msk.f32.vlgmr.msra.gmra.mrb[6].mxu0 %vm857_vm2, %v1182_v46  ;;  %v1938_v46 = vld [vmem:[%s4796_s10 + $0x18] sm:$0xff] }
 0x4e2   : > { %3587 = vmatpush3.xpose.msk.msra.mxu0 %vm857_vm2, %v1335_v47  ;;  %3588 = vmatprep.mubr.msk.f32.mxu0 %vm4127_vm0, %v4128_v1  ;;  %v3760_v47 = vpack.c.bf16 %v1938_v46, %v1937_v45 }
 0x4e3   : > { %3596 = vmatprep.subr.mxu0 %v4128_v1 }
 0x4e5   : > { %3589 = vmatmul.mubr.msk.f32.vlgmr.msra.gmra.mrb[8].mxu0 %vm857_vm2, %v1333_v49 }
 0x4e6   : > { %3598 = vmatprep.mubr.msk.f32.mxu0 %vm4127_vm0, %v4128_v1  ;;  %3597 = vmatpush3.msra.mxu0 %v852_v9 }
 0x4e7   : > { %3606 = vmatprep.subr.mxu0 %v4128_v1 }
 0x5b0   : > { %v1328_v50 = vpop.f32.mrb[4].mxu1 }
 0x5b1   : > { %v3585_v51 = vpop.f32.mrb[5].mxu1 }
 0x5b2   : > { %v1852_v51 = vld [vmem:[%s4794_s8 + $0x8] sm:$0xff] }
 0x5b4   : > { %v1255_v52 = vpop.f32.mrb[6].mxu0 }
 0x5b5   : > { %v1329_v53 = vadd.f32 %v1328_v50, %v1255_v52  ;;  %v3580_v54 = vpop.f32.mrb[7].mxu0  ;;  %v1851_v50 = vld [vmem:[%s4794_s8] sm:$0xff] }
 0x5b6   : > { %v3751_v52 = vpack.c.bf16 %v1852_v51, %v1851_v50  ;;  %v1854_v54 = vld [vmem:[%s4794_s8 + $0x18] sm:$0xff] }
 0x5b8   : > { %v1406_v55 = vpop.f32.mrb[8].mxu0 }
 0x5b9   : > { %v1410_v56 = vmul.f32 0.35355338, %v1406_v55  ;;  %v3590_v57 = vpop.f32.mrb[9].mxu0 }
 0x5bb   : > { %v1411_v58 = vsel %vm857_vm2, %v1410_v56, -inf }
 0x5bc   : > { %1412 = vmax.xlane.f32.xlu1 %v1411_v58 }
 0x5cd   : > { %1574 = vrot.lane.b32.xlu1 %v4460_v11, %s4817_s24 }
 0x5d1   : > { %1572 = vrot.lane.b32.xlu1 %v4460_v11, %s4819_s29  ;;  %s3458_s29 = sshll.u32 %s4865_s30, 4 }
 0x649   : > { %v1413_v59 = vpop.xlane.xlu1 %1412 }
 0x64a   : > { %v1414_v60 = vsub.f32 %v1410_v56, %v1413_v59 }
 0x64c   : > { %v1415_v61 = vmul.f32 1.442695, %v1414_v60  ;;  %v3416_v60 = vld [vmem:[#allocation4] ss:$0 sm:$0xff] }
 0x64d   : > { %v1575_v5 = vpop.permute.xlu1 %1574 }
 0x64e   : > { %3931 = vpow2.f32 %v1415_v61 }
 0x651   : > { %v1573_v7 = vpop.permute.xlu1 %1572 }
 0x658   : > { %v3932_v62 = vpop.eup %3931 }
 0x659   : > { %v1417_v63 = vsel %vm857_vm2, %v3932_v62, 0.0 }
 0x65a   : > { %1418 = vadd.xlane.f32.xlu0 %v1417_v63 }
 0x670   : > { %1422 = vrot.lane.b32.xlu0 %v4460_v11, %s4138_s20 }
 0x6e7   : > { %v1419_v2 = vpop.xlane.xlu0 %1418 }
 0x6e8   : > { %3933 = vrcp.f32 %v1419_v2 }
 0x6eb   : > { %v1423_v3 = vpop.permute.xlu0 %1422 }
 0x6ec   : > { %3592 = vmatpush3.msra.mxu1 %v1423_v3  ;;  %v3420_v3 = vld [vmem:[#allocation9] ss:$0 sm:$0xff] }
 0x6ed   : > { %3601 = vmatprep.subr.mxu1 %v4128_v1 }
 0x6f2   : > { %v3934_v4 = vpop.eup %3933 }
 0x6f3   : > { %v1421_v6 = vmul.f32 %v3934_v4, %v3932_v62  ;;  %v3417_v62 = vld [vmem:[#allocation6] ss:$0 sm:$0xff] }
 0x6f5   : > { %3594 = vmatmul.mubr.msk.f32.vlgmr.msra.gmra.mrb[6].mxu1 %vm857_vm2, %v1421_v6 }
 0x6f6   : > { %3602 = vmatpush3.xpose.msk.msra.mxu1 %vm857_vm2, %v1575_v5  ;;  %3603 = vmatprep.mubr.msk.f32.mxu1 %vm4127_vm0, %v4128_v1 }
 0x6f7   : > { %3611 = vmatprep.subr.mxu1 %v4128_v1 }
 0x6f9   : > { %3604 = vmatmul.mubr.msk.f32.vlgmr.msra.gmra.mrb[8].mxu1 %vm857_vm2, %v1573_v7 }
 0x6fa   : > { %3613 = vmatprep.mubr.msk.f32.mxu1 %vm4127_vm0, %v4128_v1  ;;  %3612 = vmatpush3.msra.mxu1 %v853_v23 }
 0x7c8   : > { %v1494_v10 = vpop.f32.mrb[6].mxu1 }
 0x7c9   : > { %v3595_v12 = vpop.f32.mrb[7].mxu1  ;;  %3599 = vmatmul.mubr.msk.f32.vlgmr.msra.gmra.mrb[10].mxu0 %vm857_vm2, %v1494_v10 }
 0x7ca   : > { %3608 = vmatprep.mubr.msk.f32.mxu0 %vm4127_vm0, %v4128_v1 }
 0x7cc   : > { %v1646_v13 = vpop.f32.mrb[8].mxu1 }
 0x7cd   : > { %v1650_v14 = vmul.f32 0.35355338, %v1646_v13  ;;  %v3605_v15 = vpop.f32.mrb[9].mxu1  ;;  %v3418_v13 = vld [vmem:[#allocation7] ss:$0 sm:$0xff] }
 0x7cf   : > { %v1651_v16 = vsel %vm857_vm2, %v1650_v14, -inf }
 0x7d0   : > { %1652 = vmax.xlane.f32.xlu0 %v1651_v16 }
 0x7e6   : > { %1662 = vrot.lane.b32.xlu0 %v4460_v11, %s4139_s28  ;;  %s757_s28 = scalar_lea.vmem %s4850_s21, %s3458_s29  ;;  %s4859_s21 = sld [smem:[#allocation21_spill]] }
 0x7e7   : > { %v763_v48 = vld [vmem:[%s757_s28] sm:$0xff]  ;;  %v764_v49 = vld [vmem:[%s757_s28 + $0x8] sm:$0xf]  ;;  %s4856_s28 = smov 104  }
 0x85d   : > { %v1653_v17 = vpop.xlane.xlu0 %1652 }
 0x85e   : > { %v1654_v18 = vsub.f32 %v1650_v14, %v1653_v17 }
 0x860   : > { %v1655_v19 = vmul.f32 1.442695, %v1654_v18 }
 0x861   : > { %v1663_v20 = vpop.permute.xlu0 %1662 }
 0x862   : > { %3935 = vpow2.f32 %v1655_v19  ;;  %3607 = vmatpush3.msra.mxu0 %v1663_v20 }
 0x863   : > { %3750 = vmatprep.subr.bf16.mxu0 %v4126_v0 }
 0x86c   : > { %v3936_v21 = vpop.eup %3935 }
 0x86d   : > { %v1657_v22 = vsel %vm857_vm2, %v3936_v21, 0.0 }
 0x86e   : > { %1658 = vadd.xlane.f32.xlu1 %v1657_v22 }
 0x89c   : > { %v1567_v24 = vpop.f32.mrb[10].mxu0 }
 0x89d   : > { %v1571_v25 = vadd.f32 %v1567_v24, %v1329_v53  ;;  %v3600_v11 = vpop.f32.mrb[11].mxu0  ;;  %v1853_v53 = vld [vmem:[%s4794_s8 + $0x10] sm:$0xff] }
 0x89e   : > { %v3754_v55 = vpack.c.bf16 %v1854_v54, %v1853_v53 }
 0x8fb   : > { %v1659_v26 = vpop.xlane.xlu1 %1658 }
 0x8fc   : > { %3937 = vrcp.f32 %v1659_v26 }
 0x906   : > { %v3938_v27 = vpop.eup %3937 }
 0x907   : > { %v1661_v28 = vmul.f32 %v3938_v27, %v3936_v21 }
 0x909   : > { %3609 = vmatmul.mubr.msk.f32.vlgmr.msra.gmra.mrb[12].mxu0 %vm857_vm2, %v1661_v28 }
 0x90a   : > { %3624 = vmatprep.mubr.msk.f32.mxu0 %vm4127_vm0, %v4128_v1  ;;  %3752 = vmatpush3.bf16.msra.mxu0 %v3751_v52 }
 0x90b   : > { %3753 = vmatprep.subr.bf16.mxu0 %v4126_v0 }
 0x90e   : > { %3755 = vmatpush3.bf16.msra.mxu0 %v3754_v55 }
 0x90f   : > { %3764 = vmatprep.subr.bf16.mxu0 %v4126_v0 }
 0x9dc   : > { %v1734_v29 = vpop.f32.mrb[12].mxu0 }
 0x9dd   : > { %v3610_v30 = vpop.f32.mrb[13].mxu0  ;;  %3614 = vmatmul.mubr.msk.f32.vlgmr.msra.gmra.mrb[10].mxu1 %vm857_vm2, %v1734_v29 }
 0x9de   : > { %3635 = vmatprep.mubr.msk.f32.mxu1 %vm776_vm1, %v763_v48 }
 0xab0   : > { %v1807_v31 = vpop.f32.mrb[10].mxu1 }
 0xab1   : > { %v1811_v33 = vadd.f32 %v1807_v31, %v1571_v25  ;;  %v3615_v34 = vpop.f32.mrb[11].mxu1 }
 0xab3   : > { %v1819_v35 = vadd.f32 %v3415_v32, %v1811_v33 }
 0xab5   : > { %v1820_v36 = vadd.f32 %v1819_v35, %v4450_v8  ;;  %v3756_v8 = vpack.c.bf16 %v1936_v44, %v1935_v43 }
 0xab7   : > { %v1823_v37 = vsel %vm776_vm1, %v1820_v36, 0.0  ;;  %3757 = vmatprep.subr.bf16.mxu1 %v3756_v8 }
 0xab8   : > { %1824 = vadd.xlane.f32.xlu1 %v1823_v37  ;;  %3759 = vmatpush3.bf16.msra.mxu1 %v3756_v8 }
 0xab9   : > { %3761 = vmatprep.subr.bf16.mxu1 %v3760_v47 }
 0xabc   : > { %3763 = vmatpush3.bf16.msra.mxu1 %v3760_v47 }
 0xabd   : > { %3768 = vmatprep.subr.bf16.mxu1 %v4126_v0 }
 0xabf   : > { %3636 = vmatmul.mubr.msk.f32.vlgmr.msra.gmra.mrb[12].mxu1 %vm776_vm1, %v764_v49 }
 0xac0   : > { %3649 = vmatprep.mubr.msk.f32.mxu1 %vm4127_vm0, %v4128_v1 }
 0xb45   : > { %v1825_v38 = vpop.xlane.xlu1 %1824 }
 0xb46   : > { %v1827_v39 = vmul.f32 0.03125, %v1825_v38  ;;  %v2027_v38 = vld [vmem:[%s4798_s12] sm:$0xff] }
 0xb48   : > { %v1828_v40 = vsub.f32 %v1820_v36, %v1827_v39 }
 0xb4a   : > { %v1829_v41 = vmul.f32 %v1828_v40, %v1828_v40 }
 0xb4c   : > { %v1830_v42 = vsel %vm776_vm1, %v1829_v41, 0.0 }
 0xb4d   : > { %1831 = vadd.xlane.f32.xlu1 %v1830_v42 }
 0xb92   : > { %v3637_v4 = vpop.f32.mrb[12].mxu1 }
 0xb93   : > { %v2024_v5 = vadd.f32 %v3637_v4, %v3420_v3  ;;  %v2018_v6 = vpop.f32.mrb[13].mxu1 }
 0xb94   : > { %v2019_v7 = vadd.f32 %v3420_v3, %v2018_v6 }
 0xb96   : > { %v4600_v10 = vpack.i.bf16 %v2024_v5, %v2019_v7  ;;  %v3765_v12 = vpack.c.bf16 %v2024_v5, %v2019_v7 }
 0xb98   : > { %3894 = vrot.lane.b32.xlu0 %v4600_v10, %s4129_s6 }
 0xbda   : > { %v1832_v56 = vpop.xlane.xlu1 %1831 }
 0xbdb   : > { %v1833_v57 = vmul.f32 0.03125, %v1832_v56 }
 0xbdd   : > { %v1834_v58 = vadd.f32 1e-05, %v1833_v57 }
 0xbdf   : > { %3939 = vrsqrt.f32 %v1834_v58  ;;  %v2028_v58 = vld [vmem:[%s4798_s12 + $0x8] sm:$0xff] }
 0xbe9   : > { %v3940_v59 = vpop.eup %3939 }
 0xbea   : > { %v1836_v61 = vmul.f32 %v3940_v59, %v1828_v40 }
 0xbec   : > { %v1843_v63 = vmul.f32 %v3416_v60, %v1836_v61 }
 0xbee   : > { %v4588_v2 = vadd.f32 %v3417_v62, %v1843_v63 }
 0xbf0   : > { %3625 = vmatmul.mubr.msk.f32.vlgmr.msra.gmra.mrb[14].mxu0 %vm776_vm1, %v4588_v2 }
 0xbf1   : > { %3642 = vmatprep.mubr.msk.f32.mxu0 %vm4127_vm0, %v4128_v1  ;;  %3767 = vmatpush3.bf16.xpose.msk.msra.mxu0 %vm4596_vm3, %v3765_v12 }
 0xbf2   : > { %3776 = vmatprep.subr.bf16.mxu0 %v4126_v0 }
 0xc0a   : > { %v3895_v31 = vpop.permute.xlu0 %3894 }
 0xc0b   : > { %v3897_v33 = vunpack.i.h.bf16 %v3895_v31  ;;  %v3896_v34 = vunpack.i.l.bf16 %v3895_v31 }
 0xc0d   : > { %v3773_v36 = vpack.c.bf16 %v3897_v33, %v3896_v34 }
 0xcc3   : > { %v1931_v14 = vpop.f32.mrb[14].mxu0 }
 0xcc4   : > { %v1932_v15 = vadd.f32 %v3418_v13, %v1931_v14  ;;  %v3626_v16 = vpop.f32.mrb[15].mxu0 }
 0xcc6   : > { %2204 = vrot.lane.b32.xlu0 %v1932_v15, %s4129_s6  ;;  %3643 = vmatmul.mubr.msk.f32.vlgmr.msra.gmra.mrb[16].mxu0 %vm857_vm2, %v1932_v15  ;;  %s4861_s6 = sshll.u32 %s4865_s30, 3 }
 0xcc7   : > { %3663 = vmatprep.mubr.msk.f32.mxu0 %vm4127_vm0, %v4128_v1 }
 0xd38   : > { %v2205_v37 = vpop.permute.xlu0 %2204 }
 0xd99   : > { %v2106_v17 = vpop.f32.mrb[16].mxu0 }
 0xd9a   : > { %v2110_v18 = vmul.f32 0.35355338, %v2106_v17  ;;  %v3644_v19 = vpop.f32.mrb[17].mxu0 }
 0xd9c   : > { %v2112_v20 = vsel %vm2111_vm4, %v2110_v18, -inf }
 0xd9d   : > { %2113 = vmax.xlane.f32.xlu1 %v2112_v20 }
 0xe2a   : > { %v2114_v21 = vpop.xlane.xlu1 %2113 }
 0xe2b   : > { %v2115_v22 = vsub.f32 %v2110_v18, %v2114_v21 }
 0xe2d   : > { %v2116_v23 = vmul.f32 1.442695, %v2115_v22 }
 0xe2f   : > { %3941 = vpow2.f32 %v2116_v23 }
 0xe39   : > { %v3942_v24 = vpop.eup %3941 }
 0xe3a   : > { %v2118_v25 = vsel %vm2111_vm4, %v3942_v24, 0.0 }
 0xe3b   : > { %2119 = vadd.xlane.f32.xlu1 %v2118_v25 }
 0xe4c   : > { %3889 = vrot.lane.b32.xlu1 %v4600_v10, %s4130_s3 }
 0xec8   : > { %v2120_v11 = vpop.xlane.xlu1 %2119 }
 0xec9   : > { %3943 = vrcp.f32 %v2120_v11 }
 0xecc   : > { %v3890_v26 = vpop.permute.xlu1 %3889 }
 0xecd   : > { %v3892_v27 = vunpack.i.h.bf16 %v3890_v26  ;;  %v3891_v28 = vunpack.i.l.bf16 %v3890_v26 }
 0xecf   : > { %v3769_v30 = vpack.c.bf16 %v3892_v27, %v3891_v28 }
 0xed1   : > { %3771 = vmatpush3.bf16.msk.msra.mxu1 %vm4615_vm7, %v3769_v30 }
 0xed2   : > { %3772 = vmatprep.subr.bf16.mxu1 %v4126_v0 }
 0xed3   : > { %v3944_v32 = vpop.eup %3943 }
 0xed4   : > { %v2122_v35 = vmul.f32 %v3944_v32, %v3942_v24 }
 0xed6   : > { %3650 = vmatmul.mubr.msk.f32.vlgmr.msra.gmra.mrb[14].mxu1 %vm2111_vm4, %v2122_v35 }
 0xed7   : > { %3656 = vmatprep.mubr.msk.f32.mxu1 %vm4127_vm0, %v4128_v1 }
 0xeda   : > { %3775 = vmatpush3.bf16.xpose.msk.msra.mxu1 %vm4596_vm3, %v3773_v36 }
 0xedb   : > { %3671 = vmatprep.subr.mxu1 %v4128_v1 }
 0xee1   : > { %3657 = vmatmul.mubr.msk.f32.vlgmr.msra.gmra.mrb[16].mxu1 %vm857_vm2, %v2205_v37 }
 0xee2   : > { %3673 = vmatprep.mubr.msk.f32.mxu1 %vm4127_vm0, %v4128_v1  ;;  %3672 = vmatpush3.msra.mxu1 %v2027_v38 }
 0xee3   : > { %3784 = vmatprep.subr.bf16.mxu1 %v4126_v0 }
 0xfa9   : > { %v2200_v39 = vpop.f32.mrb[14].mxu1 }
 0xfaa   : > { %v3651_v40 = vpop.f32.mrb[15].mxu1  ;;  %3674 = vmatmul.mubr.msk.f32.vlgmr.msra.gmra.mrb[18].mxu1 %vm857_vm2, %v2200_v39 }
 0xfab   : > { %3687 = vmatprep.mubr.msk.f32.mxu1 %vm4127_vm0, %v4128_v1 }
 0xfb4   : > { %v2282_v41 = vpop.f32.mrb[16].mxu1 }
 0xfb5   : > { %v2286_v42 = vmul.f32 0.35355338, %v2282_v41  ;;  %v3658_v43 = vpop.f32.mrb[17].mxu1  ;;  %v2029_v41 = vld [vmem:[%s4798_s12 + $0x10] sm:$0xff] }
 0xfb7   : > { %v2287_v44 = vsel %vm2111_vm4, %v2286_v42, -inf }
 0xfb8   : > { %2288 = vmax.xlane.f32.xlu0 %v2287_v44 }
 0xfce   : > { %3899 = vrot.lane.b32.xlu0 %v4600_v10, %s4131_s26 }
 0xfd2   : > { %2524 = vrot.lane.b32.xlu0 %v1932_v15, %s4855_s22 }
 0xfd6   : > { %3909 = vrot.lane.b32.xlu0 %v4600_v10, %s4856_s28 }
 0xfda   : > { %2772 = vrot.lane.b32.xlu0 %v1932_v15, %s4856_s28  ;;  %s4862_s28 = sld [smem:[#allocation23_spill]] }
 0xfe0   : > { %s761_s26 = scalar_lea.vmem %s4862_s28, %s4861_s6 }
0x1045   : > { %v2289_v8 = vpop.xlane.xlu0 %2288 }
0x1046   : > { %v2290_v45 = vsub.f32 %v2286_v42, %v2289_v8 }
0x1048   : > { %v2291_v46 = vmul.f32 1.442695, %v2290_v45 }
0x1049   : > { %v3900_v47 = vpop.permute.xlu0 %3899 }
0x104a   : > { %3945 = vpow2.f32 %v2291_v46  ;;  %v3902_v48 = vunpack.i.h.bf16 %v3900_v47  ;;  %v3901_v49 = vunpack.i.l.bf16 %v3900_v47 }
0x104c   : > { %v3777_v50 = vpack.c.bf16 %v3902_v48, %v3901_v49  ;;  %v2030_v49 = vld [vmem:[%s4798_s12 + $0x18] sm:$0xff] }
0x104d   : > { %v2525_v60 = vpop.permute.xlu0 %2524 }
0x104e   : > { %3779 = vmatpush3.bf16.msk.msra.mxu0 %vm4615_vm7, %v3777_v50 }
0x104f   : > { %3666 = vmatprep.subr.mxu0 %v4128_v1 }
0x1051   : > { %v3910_v4 = vpop.permute.xlu0 %3909 }
0x1052   : > { %v3912_v6 = vunpack.i.h.bf16 %v3910_v4  ;;  %v3911_v7 = vunpack.i.l.bf16 %v3910_v4 }
0x1054   : > { %v3946_v51 = vpop.eup %3945  ;;  %v3789_v12 = vpack.c.bf16 %v3912_v6, %v3911_v7  ;;  %v3061_v7 = vld [vmem:[%s4802_s16 + $0x18] sm:$0xff] }
0x1055   : > { %v2293_v52 = vsel %vm2111_vm4, %v3946_v51, 0.0  ;;  %v2773_v13 = vpop.permute.xlu0 %2772 }
0x1056   : > { %2294 = vadd.xlane.f32.xlu1 %v2293_v52 }
0x1067   : > { %3904 = vrot.lane.b32.xlu1 %v4600_v10, %s4855_s22 }
0x107d   : > { %v2520_v53 = vpop.f32.mrb[18].mxu1 }
0x107e   : > { %v3675_v54 = vpop.f32.mrb[19].mxu1 }
0x10e3   : > { %v2295_v55 = vpop.xlane.xlu1 %2294 }
0x10e4   : > { %3947 = vrcp.f32 %v2295_v55  ;;  %v3447_v55 = vld [vmem:[%s4799_s13] ss:$0 sm:$0xff] }
0x10e7   : > { %v3905_v59 = vpop.permute.xlu1 %3904 }
0x10e8   : > { %v3907_v61 = vunpack.i.h.bf16 %v3905_v59  ;;  %v3906_v62 = vunpack.i.l.bf16 %v3905_v59 }
0x10ea   : > { %v3781_v63 = vpack.c.bf16 %v3907_v61, %v3906_v62 }
0x10ee   : > { %v3948_v56 = vpop.eup %3947 }
0x10ef   : > { %v2297_v57 = vmul.f32 %v3948_v56, %v3946_v51 }
0x10f1   : > { %3664 = vmatmul.mubr.msk.f32.vlgmr.msra.gmra.mrb[18].mxu0 %vm2111_vm4, %v2297_v57 }
0x10f2   : > { %3667 = vmatpush3.msra.mxu0 %v2028_v58  ;;  %3668 = vmatprep.mubr.msk.f32.mxu0 %vm4127_vm0, %v4128_v1 }
0x10f3   : > { %3780 = vmatprep.subr.bf16.mxu0 %v4126_v0 }
0x11c4   : > { %v2374_v3 = vpop.f32.mrb[18].mxu0 }
0x11c5   : > { %v3665_v5 = vpop.f32.mrb[19].mxu0  ;;  %3669 = vmatmul.mubr.msk.f32.vlgmr.msra.gmra.mrb[20].mxu0 %vm857_vm2, %v2374_v3 }
0x11c6   : > { %3783 = vmatpush3.bf16.xpose.msk.msra.mxu0 %vm4596_vm3, %v3781_v63  ;;  %3680 = vmatprep.mubr.msk.f32.mxu0 %vm4127_vm0, %v4128_v1  ;;  %v3059_v5 = vld [vmem:[%s4802_s16 + $0x8] sm:$0xff] }
0x11c7   : > { %3788 = vmatprep.subr.bf16.mxu0 %v4126_v0 }
0x11cd   : > { %3681 = vmatmul.mubr.msk.f32.vlgmr.msra.gmra.mrb[22].mxu0 %vm857_vm2, %v2525_v60 }
0x11ce   : > { %3791 = vmatpush3.bf16.xpose.msk.msra.mxu0 %vm4596_vm3, %v3789_v12  ;;  %3699 = vmatprep.mubr.msk.f32.mxu0 %vm4127_vm0, %v4128_v1 }
0x11cf   : > { %3796 = vmatprep.subr.bf16.mxu0 %v4126_v0 }
0x11d5   : > { %3700 = vmatmul.mubr.msk.f32.vlgmr.msra.gmra.mrb[24].mxu0 %vm857_vm2, %v2773_v13  ;;  %v3143_v13 = vld [vmem:[%s4804_s18] sm:$0xff] }
0x11d6   : > { %3722 = vmatprep.mubr.msk.f32.mxu0 %vm4127_vm0, %v4128_v1 }
0x1298   : > { %v2447_v14 = vpop.f32.mrb[20].mxu0 }
0x1299   : > { %v4673_v15 = vadd.f32 %v2520_v53, %v2447_v14  ;;  %v3670_v16 = vpop.f32.mrb[21].mxu0  ;;  %v3144_v14 = vld [vmem:[%s4804_s18 + $0x8] sm:$0xff] }
0x129a   : > { %v3803_v16 = vpack.c.bf16 %v3144_v14, %v3143_v13 }
0x12a0   : > { %v2602_v17 = vpop.f32.mrb[22].mxu0 }
0x12a1   : > { %v2606_v18 = vmul.f32 0.35355338, %v2602_v17  ;;  %v3682_v19 = vpop.f32.mrb[23].mxu0  ;;  %v3146_v17 = vld [vmem:[%s4804_s18 + $0x18] sm:$0xff] }
0x12a2   : > { %v3147_v19 = vld [vmem:[%s4804_s18 + $0x20] sm:$0xff] }
0x12a3   : > { %v2607_v9 = vsel %vm2111_vm4, %v2606_v18, -inf }
0x12a4   : > { %2608 = vmax.xlane.f32.xlu1 %v2607_v9  ;;  %v3148_v9 = vld [vmem:[%s4804_s18 + $0x28] sm:$0xff] }
0x12a8   : > { %v2850_v20 = vpop.f32.mrb[24].mxu0 }
0x12a9   : > { %v2854_v21 = vmul.f32 0.35355338, %v2850_v20  ;;  %v3701_v22 = vpop.f32.mrb[25].mxu0  ;;  %v3809_v20 = vpack.c.bf16 %v3148_v9, %v3147_v19 }
0x12ab   : > { %v2855_v23 = vsel %vm2111_vm4, %v2854_v21, -inf }
0x12ac   : > { %2856 = vmax.xlane.f32.xlu1 %v2855_v23 }
0x1331   : > { %v2609_v24 = vpop.xlane.xlu1 %2608 }
0x1332   : > { %v2610_v25 = vsub.f32 %v2606_v18, %v2609_v24 }
0x1334   : > { %v2611_v11 = vmul.f32 1.442695, %v2610_v25  ;;  %v3448_v25 = vld [vmem:[%s4800_s14] ss:$0 sm:$0xff] }
0x1336   : > { %3949 = vpow2.f32 %v2611_v11 }
0x1339   : > { %v2857_v26 = vpop.xlane.xlu1 %2856 }
0x133a   : > { %v2858_v27 = vsub.f32 %v2854_v21, %v2857_v26  ;;  %v3449_v26 = vld [vmem:[%s4801_s15] ss:$0 sm:$0xff] }
0x133c   : > { %v2859_v28 = vmul.f32 1.442695, %v2858_v27 }
0x133e   : > { %3951 = vpow2.f32 %v2859_v28 }
0x1340   : > { %v3950_v30 = vpop.eup %3949 }
0x1341   : > { %v2613_v31 = vsel %vm2111_vm4, %v3950_v30, 0.0 }
0x1342   : > { %2614 = vadd.xlane.f32.xlu0 %v2613_v31 }
0x1348   : > { %v3952_v32 = vpop.eup %3951 }
0x1349   : > { %v2861_v33 = vsel %vm2111_vm4, %v3952_v32, 0.0 }
0x134a   : > { %2862 = vadd.xlane.f32.xlu1 %v2861_v33 }
0x1358   : > { %3914 = vrot.lane.b32.xlu0 %v4600_v10, %s4857_s4 }
0x135b   : > { %3919 = vrot.lane.b32.xlu1 %v4600_v10, %s4858_s23 }
0x13cf   : > { %v2615_v34 = vpop.xlane.xlu0 %2614 }
0x13d0   : > { %3953 = vrcp.f32 %v2615_v34 }
0x13d3   : > { %v3915_v35 = vpop.permute.xlu0 %3914 }
0x13d4   : > { %v3917_v36 = vunpack.i.h.bf16 %v3915_v35  ;;  %v3916_v37 = vunpack.i.l.bf16 %v3915_v35 }
0x13d6   : > { %v3785_v38 = vpack.c.bf16 %v3917_v36, %v3916_v37  ;;  %v3452_v37 = vld [vmem:[%s4805_s19] ss:$0 sm:$0xff] }
0x13d7   : > { %v2863_v10 = vpop.xlane.xlu1 %2862 }
0x13d8   : > { %3787 = vmatpush3.bf16.msk.msra.mxu1 %vm4615_vm7, %v3785_v38  ;;  %3955 = vrcp.f32 %v2863_v10 }
0x13d9   : > { %3690 = vmatprep.subr.mxu1 %v4128_v1 }
0x13da   : > { %v3954_v39 = vpop.eup %3953 }
0x13db   : > { %v2617_v40 = vmul.f32 %v3954_v39, %v3950_v30  ;;  %v3920_v42 = vpop.permute.xlu1 %3919  ;;  %v3150_v30 = vld [vmem:[%s4804_s18 + $0x38] sm:$0xff] }
0x13dc   : > { %v3922_v43 = vunpack.i.h.bf16 %v3920_v42  ;;  %v3921_v44 = vunpack.i.l.bf16 %v3920_v42 }
0x13dd   : > { %3688 = vmatmul.mubr.msk.f32.vlgmr.msra.gmra.mrb[20].mxu1 %vm2111_vm4, %v2617_v40 }
0x13de   : > { %3691 = vmatpush3.msra.mxu1 %v2029_v41  ;;  %3692 = vmatprep.mubr.msk.f32.mxu1 %vm4127_vm0, %v4128_v1  ;;  %v3793_v45 = vpack.c.bf16 %v3922_v43, %v3921_v44 }
0x13df   : > { %3792 = vmatprep.subr.bf16.mxu1 %v4126_v0 }
0x13e2   : > { %v3956_v8 = vpop.eup %3955 }
0x13e3   : > { %v2865_v48 = vmul.f32 %v3956_v8, %v3952_v32  ;;  %v3450_v32 = vld [vmem:[%s4803_s17] ss:$0 sm:$0xff] }
0x14b0   : > { %v2694_v46 = vpop.f32.mrb[20].mxu1 }
0x14b1   : > { %v3689_v47 = vpop.f32.mrb[21].mxu1  ;;  %3693 = vmatmul.mubr.msk.f32.vlgmr.msra.gmra.mrb[22].mxu1 %vm857_vm2, %v2694_v46 }
0x14b2   : > { %3795 = vmatpush3.bf16.msk.msra.mxu1 %vm4615_vm7, %v3793_v45  ;;  %3706 = vmatprep.mubr.msk.f32.mxu1 %vm4127_vm0, %v4128_v1 }
0x14b3   : > { %3709 = vmatprep.subr.mxu1 %v4128_v1 }
0x14b5   : > { %3707 = vmatmul.mubr.msk.f32.vlgmr.msra.gmra.mrb[24].mxu1 %vm2111_vm4, %v2865_v48 }
0x14b6   : > { %3711 = vmatprep.mubr.msk.f32.mxu1 %vm4127_vm0, %v4128_v1  ;;  %3710 = vmatpush3.msra.mxu1 %v2030_v49 }
0x14b7   : > { %3802 = vmatprep.subr.bf16.mxu1 %v4126_v0 }
0x1584   : > { %v2767_v29 = vpop.f32.mrb[22].mxu1 }
0x1585   : > { %v2771_v50 = vadd.f32 %v2767_v29, %v4673_v15  ;;  %v3694_v51 = vpop.f32.mrb[23].mxu1  ;;  %v3145_v15 = vld [vmem:[%s4804_s18 + $0x10] sm:$0xff]  ;;  %v3454_v29 = vld [vmem:[%s4859_s21] ss:$0 sm:$0xff] }
0x1586   : > { %v3806_v18 = vpack.c.bf16 %v3146_v17, %v3145_v15  ;;  %v3455_v51 = vld [vmem:[%s4860_s25] ss:$0 sm:$0xff] }
0x1588   : > { %v2942_v52 = vpop.f32.mrb[24].mxu1 }
0x1589   : > { %v3708_v53 = vpop.f32.mrb[25].mxu1  ;;  %3712 = vmatmul.mubr.msk.f32.vlgmr.msra.gmra.mrb[26].mxu1 %vm857_vm2, %v2942_v52 }
0x158a   : > { %3741 = vmatprep.mubr.msk.f32.mxu1 %vm4127_vm0, %v4128_v1  ;;  %v3058_v1 = vld [vmem:[%s4802_s16] sm:$0xff]  ;;  %3804 = vmatpush3.bf16.msra.mxu1 %v3803_v16 }
0x158b   : > { %v3797_v6 = vpack.c.bf16 %v3059_v5, %v3058_v1  ;;  %3805 = vmatprep.subr.bf16.mxu1 %v4126_v0 }
0x158d   : > { %3798 = vmatpush3.bf16.msra.mxu0 %v3797_v6 }
0x158e   : > { %3799 = vmatprep.subr.bf16.mxu0 %v4126_v0  ;;  %3807 = vmatpush3.bf16.msra.mxu1 %v3806_v18 }
0x158f   : > { %3808 = vmatprep.subr.bf16.mxu1 %v4126_v0 }
0x1592   : > { %3810 = vmatpush3.bf16.msra.mxu1 %v3809_v20 }
0x1593   : > { %3811 = vmatprep.subr.bf16.mxu1 %v4126_v0  ;;  %v3149_v0 = vld [vmem:[%s4804_s18 + $0x30] sm:$0xff] }
0x1594   : > { %v3812_v31 = vpack.c.bf16 %v3150_v30, %v3149_v0 }
0x1596   : > { %3813 = vmatpush3.bf16.msra.mxu1 %v3812_v31 }
0x165c   : > { %v3015_v54 = vpop.f32.mrb[26].mxu1 }
0x165d   : > { %v3019_v56 = vadd.f32 %v3015_v54, %v2771_v50  ;;  %v3713_v57 = vpop.f32.mrb[27].mxu1 }
0x165f   : > { %v3027_v58 = vadd.f32 %v3447_v55, %v3019_v56 }
0x1661   : > { %v3028_v59 = vadd.f32 %v3027_v58, %v4588_v2  ;;  %v3060_v2 = vld [vmem:[%s4802_s16 + $0x10] sm:$0xff] }
0x1662   : > { %v3800_v12 = vpack.c.bf16 %v3061_v7, %v3060_v2 }
0x1663   : > { %v3031_v60 = vsel %vm776_vm1, %v3028_v59, 0.0 }
0x1664   : > { %3032 = vadd.xlane.f32.xlu0 %v3031_v60  ;;  %3801 = vmatpush3.bf16.msra.mxu0 %v3800_v12 }
0x16f1   : > { %v3033_v61 = vpop.xlane.xlu0 %3032 }
0x16f2   : > { %v3034_v62 = vmul.f32 0.03125, %v3033_v61 }
0x16f4   : > { %v3035_v63 = vsub.f32 %v3028_v59, %v3034_v62 }
0x16f6   : > { %v3036_v3 = vmul.f32 %v3035_v63, %v3035_v63 }
0x16f8   : > { %v3037_v4 = vsel %vm776_vm1, %v3036_v3, 0.0 }
0x16f9   : > { %3038 = vadd.xlane.f32.xlu1 %v3037_v4 }
0x1786   : > { %v3039_v21 = vpop.xlane.xlu1 %3038 }
0x1787   : > { %v3040_v22 = vmul.f32 0.03125, %v3039_v21 }
0x1789   : > { %v3041_v23 = vadd.f32 1e-05, %v3040_v22 }
0x178b   : > { %3957 = vrsqrt.f32 %v3041_v23 }
0x1795   : > { %v3958_v24 = vpop.eup %3957 }
0x1796   : > { %v3043_v11 = vmul.f32 %v3958_v24, %v3035_v63 }
0x1798   : > { %v3050_v27 = vmul.f32 %v3448_v25, %v3043_v11 }
0x179a   : > { %v3057_v28 = vadd.f32 %v3449_v26, %v3050_v27 }
0x179c   : > { %3723 = vmatmul.mubr.msk.f32.vlgmr.msra.gmra.mrb[26].mxu0 %vm776_vm1, %v3057_v28 }
0x186f   : > { %v3138_v33 = vpop.f32.mrb[26].mxu0 }
0x1870   : > { %v3139_v34 = vadd.f32 %v3450_v32, %v3138_v33  ;;  %v3724_v35 = vpop.f32.mrb[27].mxu0 }
0x1872   : > { %v3142_v36 = vmax.f32 %v3139_v34, 0.0 }
0x1874   : > { %3742 = vmatmul.mubr.msk.f32.vlgmr.msra.gmra.mrb[28].mxu1 %vm3158_vm8, %v3142_v36 }
0x1947   : > { %v3228_v38 = vpop.f32.mrb[28].mxu1 }
0x1948   : > { %v3229_v39 = vadd.f32 %v3452_v37, %v3228_v38  ;;  %v3743_v40 = vpop.f32.mrb[29].mxu1 }
0x194a   : > { %v3232_v41 = vadd.f32 %v3229_v39, %v3057_v28 }
0x194c   : > { %v3235_v10 = vsel %vm776_vm1, %v3232_v41, 0.0 }
0x194d   : > { %3236 = vadd.xlane.f32.xlu0 %v3235_v10 }
0x19da   : > { %v3237_v42 = vpop.xlane.xlu0 %3236 }
0x19db   : > { %v3238_v43 = vmul.f32 0.03125, %v3237_v42 }
0x19dd   : > { %v3239_v44 = vsub.f32 %v3232_v41, %v3238_v43 }
0x19df   : > { %v3240_v8 = vmul.f32 %v3239_v44, %v3239_v44 }
0x19e1   : > { %v3241_v45 = vsel %vm776_vm1, %v3240_v8, 0.0 }
0x19e2   : > { %3242 = vadd.xlane.f32.xlu0 %v3241_v45 }
0x1a6f   : > { %v3243_v46 = vpop.xlane.xlu0 %3242 }
0x1a70   : > { %v3244_v47 = vmul.f32 0.03125, %v3243_v46 }
0x1a72   : > { %v3245_v48 = vadd.f32 1e-05, %v3244_v47 }
0x1a74   : > { %3959 = vrsqrt.f32 %v3245_v48 }
0x1a7e   : > { %v3960_v49 = vpop.eup %3959 }
0x1a7f   : > { %v3247_v50 = vmul.f32 %v3960_v49, %v3239_v44 }
0x1a81   : > { %v3254_v52 = vmul.f32 %v3454_v29, %v3247_v50 }
0x1a83   : > { %v3261_v53 = vadd.f32 %v3455_v51, %v3254_v52 }
0x1a85   : > { %3262 = vst.msk [vmem:[%s761_s26] sm:$0xff] %vm776_vm1, %v3261_v53 }
0x1a86 PF: > { %s4863_s5 = sld [smem:[#allocation13_spill]] }
0x1a8c   : > { %s35_s3 = sadd.s32 1, %s4863_s5  }
0x1a8d   : > { %p32_p9 = scmp.ge.s32.totalorder %s35_s3, 4  }
0x1a8f   :  { %34 = sbr.rel (!%p32_p9) target bundleno = 14 (0xe), region = 162 }
0x1a96   :  { %3282 = vsyncpa [#allocation3], 1 }
0x1a97   :  { %3284 = vsyncpa [#allocation3 + $0x1], 1 }
0x1a98   :  { %3285 = vsyncpa [#allocation5], 1 }
0x1a99   :  { %3286 = vsyncpa [#allocation8], 1 }

</bundles_post_ra>
